<compile_context>
chip_gen: v5e
topology: v5e:2x2
jax: 0.10.0
libtpu: 0.0.40
codegen_flags: <defaults>
</compile_context>

<pallas_src>
import functools

import jax
import jax.numpy as jnp
from jax.experimental import pallas as pl
from jax.experimental.pallas import tpu as pltpu


INPUT_DIM = 8
HIDDEN_DIM = 32
OUTPUT_DIM = 4


# ---------------------------------------------------------------------------
# Graph preprocessing (hoisted out of the per-forward path; cache per batch).
# ---------------------------------------------------------------------------
def prepare_graph(edge_index, batch, num_nodes, n_pad):
    """Dense adj (bf16, padded), dinv = rsqrt(deg) (f32 [n_pad,1]), batch ids.

    adj[dst, src] = 1 per edge (duplicates de-duplicated), plus self-loops
    (GCNConv default add_self_loops=True).  Padded nodes get dinv = 0 (never
    NaN/inf) and batch id = -1 (excluded from pooling).
    """
    adj = jnp.zeros((num_nodes, num_nodes), jnp.float32)
    adj = adj.at[edge_index[1], edge_index[0]].set(1.0)
    adj = jnp.maximum(adj, jnp.eye(num_nodes, dtype=jnp.float32))
    deg = jnp.sum(adj, axis=1, keepdims=True)          # >= 1 thanks to self-loops
    dinv = jax.lax.rsqrt(deg)                          # [N, 1]

    pad = n_pad - num_nodes
    adj_p = jnp.pad(adj, ((0, pad), (0, pad))).astype(jnp.bfloat16)
    dinv_p = jnp.pad(dinv, ((0, pad), (0, 0)))                         # pads -> 0
    batch_p = jnp.pad(batch.astype(jnp.int32), (0, pad),
                      constant_values=-1).reshape(1, -1)               # pads -> -1
    return {"adj": adj_p, "dinv": dinv_p, "batch": batch_p}


# ---------------------------------------------------------------------------
# Tiled GCN layer: grid = (dest-row tiles ["parallel"], source-K tiles ["arbitrary"])
# ---------------------------------------------------------------------------
def _gcn_layer_kernel(adj_ref, h_ref, dinv_src_ref, dinv_dst_ref, w_ref, b_ref,
                      out_ref, acc_ref):
    k = pl.program_id(1)

    @pl.when(k == 0)
    def _():
        acc_ref[...] = jnp.zeros_like(acc_ref)

    # Project + source-scale this K tile of nodes.  (Recomputed per row tile;
    # extra cost ratio is F_in/TM vs. the N^2 aggregation -- negligible.)
    p = jnp.dot(h_ref[...], w_ref[...], preferred_element_type=jnp.float32)
    p = (p * dinv_src_ref[...]).astype(jnp.bfloat16)
    # bf16 x bf16 aggregation on the MXU, f32 accumulation.
    acc_ref[...] += jnp.dot(adj_ref[...], p, preferred_element_type=jnp.float32)

    @pl.when(k == pl.num_programs(1) - 1)
    def _():
        out_ref[...] = jnp.maximum(
            acc_ref[...] * dinv_dst_ref[...] + b_ref[...], 0.0)


def _layer_vmem_bytes(tm, tk, f_in, f_out):
    return (2 * tm * tk * 2            # adj tiles (bf16, double buffered)
            + 2 * tk * f_in * 4        # source feature tiles
            + 2 * (tm + tk) * 4        # dinv tiles
            + 2 * tm * f_out * 4       # output tiles
            + tm * f_out * 4           # f32 accumulator scratch
            + (f_in + 1) * f_out * 4)  # weights + bias


def _gcn_layer(h, adj, dinv, w, b, *, tm, tk):
    n_pad = adj.shape[0]
    f_in, f_out = w.shape
    grid = (n_pad // tm, n_pad // tk)
    vmem_limit = min(_layer_vmem_bytes(tm, tk, f_in, f_out) + (4 << 20), 56 << 20)
    return pl.pallas_call(
        _gcn_layer_kernel,
        out_shape=jax.ShapeDtypeStruct((n_pad, f_out), jnp.float32),
        grid_spec=pltpu.PrefetchScalarGridSpec(
            num_scalar_prefetch=0,
            grid=grid,
            in_specs=[
                pl.BlockSpec((tm, tk), lambda i, k: (i, k)),      # adj tile
                pl.BlockSpec((tk, f_in), lambda i, k: (k, 0)),    # source features
                pl.BlockSpec((tk, 1), lambda i, k: (k, 0)),       # dinv (sources)
                pl.BlockSpec((tm, 1), lambda i, k: (i, 0)),       # dinv (dests)
                pl.BlockSpec((f_in, f_out), lambda i, k: (0, 0)),  # W
                pl.BlockSpec((1, f_out), lambda i, k: (0, 0)),     # b
            ],
            out_specs=pl.BlockSpec((tm, f_out), lambda i, k: (i, 0)),
            scratch_shapes=[pltpu.VMEM((tm, f_out), jnp.float32)],
        ),
        compiler_params=pltpu.CompilerParams(
            dimension_semantics=("parallel", "arbitrary"),
            vmem_limit_bytes=vmem_limit,
        ),
    )(adj, h, dinv, dinv, w, b)


# ---------------------------------------------------------------------------
# global_add_pool + Linear: per-row-tile pooled accumulator (P3), fc at finalize.
# ---------------------------------------------------------------------------
def _pool_fc_kernel(batch_ref, h_ref, wfc_ref, bfc_ref, out_ref, pooled_ref, *,
                    num_graphs):
    r = pl.program_id(0)

    @pl.when(r == 0)
    def _():
        pooled_ref[...] = jnp.zeros_like(pooled_ref)

    tm = h_ref.shape[0]
    gids = jax.lax.broadcasted_iota(jnp.int32, (num_graphs, tm), 0)
    onehot = (batch_ref[...] == gids).astype(jnp.float32)        # [B, TM] in-kernel
    pooled_ref[...] += jnp.dot(onehot, h_ref[...],
                               preferred_element_type=jnp.float32)

    @pl.when(r == pl.num_programs(0) - 1)
    def _():
        out_ref[...] = (jnp.dot(pooled_ref[...], wfc_ref[...],
                                preferred_element_type=jnp.float32)
                        + bfc_ref[...])


def _pool_fc(h, batch, wfc, bfc, *, num_graphs, tm):
    n_pad, hidden = h.shape
    out_dim = wfc.shape[1]
    kernel = functools.partial(_pool_fc_kernel, num_graphs=num_graphs)
    return pl.pallas_call(
        kernel,
        out_shape=jax.ShapeDtypeStruct((num_graphs, out_dim), jnp.float32),
        grid_spec=pltpu.PrefetchScalarGridSpec(
            num_scalar_prefetch=0,
            grid=(n_pad // tm,),
            in_specs=[
                pl.BlockSpec((1, tm), lambda r: (0, r)),          # batch ids
                pl.BlockSpec((tm, hidden), lambda r: (r, 0)),     # h2 rows
                pl.BlockSpec((hidden, out_dim), lambda r: (0, 0)),
                pl.BlockSpec((1, out_dim), lambda r: (0, 0)),
            ],
            out_specs=pl.BlockSpec((num_graphs, out_dim), lambda r: (0, 0)),
            scratch_shapes=[pltpu.VMEM((num_graphs, hidden), jnp.float32)],
        ),
        compiler_params=pltpu.CompilerParams(
            dimension_semantics=("arbitrary",)),
    )(batch, h, wfc, bfc)


def gnn_forward_tiled(params, x, graph, num_graphs, *, tm=512, tk=512):
    """Scalable path: per-layer tiled aggregation + accumulating pool/fc."""
    adj, dinv, batch = graph["adj"], graph["dinv"], graph["batch"]
    n_pad = adj.shape[0]
    assert n_pad % tm == 0 and n_pad % tk == 0, (n_pad, tm, tk)
    x_p = jnp.pad(x, ((0, n_pad - x.shape[0]), (0, 0)))

    h1 = _gcn_layer(x_p, adj, dinv, params["w1"], params["b1"].reshape(1, -1),
                    tm=tm, tk=tk)
    h2 = _gcn_layer(h1, adj, dinv, params["w2"], params["b2"].reshape(1, -1),
                    tm=tm, tk=tk)
    return _pool_fc(h2, batch, params["wfc"], params["bfc"].reshape(1, -1),
                    num_graphs=num_graphs, tm=tm)


# ---------------------------------------------------------------------------
# Fully fused single-launch path (small graphs: adj fits comfortably in VMEM)
# ---------------------------------------------------------------------------
def _gnn_fused_kernel(adj_ref, dinv_ref, batch_ref, x_ref, w1_ref, b1_ref,
                      w2_ref, b2_ref, wfc_ref, bfc_ref, out_ref, *, num_graphs):
    adj = adj_ref[...]          # [N, N]  bf16
    dinv = dinv_ref[...]        # [N, 1]  f32 (precomputed in wrapper)
    x = x_ref[...]              # [N, F_in] f32
    batch = batch_ref[...]      # [1, N] int32
    n = adj.shape[0]

    def layer(h, w, b):
        p = jnp.dot(h, w, preferred_element_type=jnp.float32)     # project
        p = (p * dinv).astype(jnp.bfloat16)                       # scale sources
        agg = jnp.dot(adj, p, preferred_element_type=jnp.float32)  # aggregate (MXU bf16)
        return jnp.maximum(agg * dinv + b, 0.0)                   # scale dests + bias + relu

    h1 = layer(x, w1_ref[...], b1_ref[...])
    h2 = layer(h1, w2_ref[...], b2_ref[...])

    # global_add_pool via in-kernel one-hot (padded nodes have batch id -1).
    gids = jax.lax.broadcasted_iota(jnp.int32, (num_graphs, n), 0)
    pool = (batch == gids).astype(jnp.float32)                    # [B, N]
    pooled = jnp.dot(pool, h2, preferred_element_type=jnp.float32)
    out_ref[...] = (jnp.dot(pooled, wfc_ref[...],
                            preferred_element_type=jnp.float32) + bfc_ref[...])


def gnn_forward_fused(params, x, graph, num_graphs):
    adj, dinv, batch = graph["adj"], graph["dinv"], graph["batch"]
    n_pad = adj.shape[0]
    x_p = jnp.pad(x, ((0, n_pad - x.shape[0]), (0, 0)))
    hidden = params["w1"].shape[1]
    out_dim = params["wfc"].shape[1]

    est = (2 * n_pad * n_pad                              # bf16 adj
           + 4 * n_pad * (x.shape[1] + 3 * hidden + 2)    # x, h1, h2, proj, dinv
           + 4 * num_graphs * (n_pad + hidden + out_dim))
    vmem = pl.BlockSpec(memory_space=pltpu.MemorySpace.VMEM)
    kernel = functools.partial(_gnn_fused_kernel, num_graphs=num_graphs)
    return pl.pallas_call(
        kernel,
        out_shape=jax.ShapeDtypeStruct((num_graphs, out_dim), jnp.float32),
        in_specs=[vmem] * 10,
        out_specs=vmem,
        compiler_params=pltpu.CompilerParams(
            vmem_limit_bytes=min(est + (8 << 20), 56 << 20)),
    )(adj, dinv, batch, x_p,
      params["w1"], params["b1"].reshape(1, -1),
      params["w2"], params["b2"].reshape(1, -1),
      params["wfc"], params["bfc"].reshape(1, -1))


# ---------------------------------------------------------------------------
# Pure-JAX reference (f32) for correctness checking.
# ---------------------------------------------------------------------------
def gnn_reference(params, x, edge_index, batch, num_graphs):
    n = x.shape[0]
    adj = jnp.zeros((n, n), jnp.float32).at[edge_index[1], edge_index[0]].set(1.0)
    adj = jnp.maximum(adj, jnp.eye(n, dtype=jnp.float32))
    dinv = 1.0 / jnp.sqrt(jnp.sum(adj, axis=1, keepdims=True))

    def layer(h, w, b):
        agg = adj @ ((h @ w) * dinv)
        return jax.nn.relu(agg * dinv + b)

    h1 = layer(x, params["w1"], params["b1"])
    h2 = layer(h1, params["w2"], params["b2"])
    onehot = (batch[None, :] == jnp.arange(num_graphs)[:, None]).astype(jnp.float32)
    return onehot @ h2 @ params["wfc"] + params["bfc"]


# ---------------------------------------------------------------------------
# Params
# ---------------------------------------------------------------------------
def init_params(key):
    ks = jax.random.split(key, 6)
    s = 0.1
    return {
        "w1": s * jax.random.normal(ks[0], (INPUT_DIM, HIDDEN_DIM), jnp.float32),
        "b1": s * jax.random.normal(ks[1], (HIDDEN_DIM,), jnp.float32),
        "w2": s * jax.random.normal(ks[2], (HIDDEN_DIM, HIDDEN_DIM), jnp.float32),
        "b2": s * jax.random.normal(ks[3], (HIDDEN_DIM,), jnp.float32),
        "wfc": s * jax.random.normal(ks[4], (HIDDEN_DIM, OUTPUT_DIM), jnp.float32),
        "bfc": s * jax.random.normal(ks[5], (OUTPUT_DIM,), jnp.float32),
    }


if __name__ == "__main__":
    key = jax.random.PRNGKey(0)
    k_x, k_p = jax.random.split(key)

    # Two graphs of 8 nodes each, bidirectional ring edges within each graph.
    num_graphs = 2
    nodes_per_graph = 8
    n = num_graphs * nodes_per_graph

    x = jax.random.normal(k_x, (n, INPUT_DIM), jnp.float32)

    src, dst = [], []
    for g in range(num_graphs):
        base = g * nodes_per_graph
        for i in range(nodes_per_graph):
            j = (i + 1) % nodes_per_graph
            src += [base + i, base + j]
            dst += [base + j, base + i]
    edge_index = jnp.array([src, dst], dtype=jnp.int32)          # [2, 32]
    batch = jnp.repeat(jnp.arange(num_graphs, dtype=jnp.int32), nodes_per_graph)

    params = init_params(k_p)

    # Small tiles + padding to 256 nodes so the tiled path exercises a real
    # 2x2 (rows x K) grid with accumulation at toy size.  For production-size
    # graphs use tm=tk=512 (default) or larger on v5e/v6e.
    tm = tk = 128
    n_pad = 2 * tk
    graph = prepare_graph(edge_index, batch, n, n_pad)

    ref = gnn_reference(params, x, edge_index, batch, num_graphs)
    out_fused = jax.block_until_ready(gnn_forward_fused(params, x, graph, num_graphs))
    out_tiled = jax.block_until_ready(
        gnn_forward_tiled(params, x, graph, num_graphs, tm=tm, tk=tk))

    assert out_fused.shape == (num_graphs, OUTPUT_DIM), out_fused.shape
    assert out_tiled.shape == (num_graphs, OUTPUT_DIM), out_tiled.shape
    assert bool(jnp.all(jnp.isfinite(out_fused)))
    assert bool(jnp.all(jnp.isfinite(out_tiled)))
    # bf16 aggregation -> loose tolerance vs. the f32 reference.
    assert bool(jnp.allclose(out_fused, ref, rtol=3e-2, atol=3e-2))
    assert bool(jnp.allclose(out_tiled, ref, rtol=3e-2, atol=3e-2))
    print("KERNEL_OK")
</pallas_src>

<mosaic_0001>
module attributes {stable_mosaic.version = 11 : i64} {
  func.func @_gnn_fused_kernel(%arg0: memref<256x256xbf16, #tpu.memory_space<vmem>>, %arg1: memref<256x1xf32, #tpu.memory_space<vmem>>, %arg2: memref<1x256xi32, #tpu.memory_space<vmem>>, %arg3: memref<256x8xf32, #tpu.memory_space<vmem>>, %arg4: memref<8x32xf32, #tpu.memory_space<vmem>>, %arg5: memref<1x32xf32, #tpu.memory_space<vmem>>, %arg6: memref<32x32xf32, #tpu.memory_space<vmem>>, %arg7: memref<1x32xf32, #tpu.memory_space<vmem>>, %arg8: memref<32x4xf32, #tpu.memory_space<vmem>>, %arg9: memref<1x4xf32, #tpu.memory_space<vmem>>, %arg10: memref<2x4xf32, #tpu.memory_space<vmem>>) attributes {dimension_semantics = [], scalar_prefetch = 0 : i64, scratch_operands = 0 : i64, tpu.core_type = #tpu.core_type<tc>} {
    %c0 = arith.constant 0 : index
    %c0_0 = arith.constant 0 : index
    %0 = vector.load %arg0[%c0, %c0_0] : memref<256x256xbf16, #tpu.memory_space<vmem>>, vector<256x256xbf16>
    %c0_1 = arith.constant 0 : index
    %c0_2 = arith.constant 0 : index
    %1 = vector.load %arg1[%c0_1, %c0_2] : memref<256x1xf32, #tpu.memory_space<vmem>>, vector<256x1xf32>
    %c0_3 = arith.constant 0 : index
    %c0_4 = arith.constant 0 : index
    %2 = vector.load %arg3[%c0_3, %c0_4] : memref<256x8xf32, #tpu.memory_space<vmem>>, vector<256x8xf32>
    %c0_5 = arith.constant 0 : index
    %c0_6 = arith.constant 0 : index
    %3 = vector.load %arg2[%c0_5, %c0_6] : memref<1x256xi32, #tpu.memory_space<vmem>>, vector<1x256xi32>
    %c0_7 = arith.constant 0 : index
    %c0_8 = arith.constant 0 : index
    %4 = vector.load %arg4[%c0_7, %c0_8] : memref<8x32xf32, #tpu.memory_space<vmem>>, vector<8x32xf32>
    %c0_9 = arith.constant 0 : index
    %c0_10 = arith.constant 0 : index
    %5 = vector.load %arg5[%c0_9, %c0_10] : memref<1x32xf32, #tpu.memory_space<vmem>>, vector<1x32xf32>
    %cst = arith.constant dense<0.000000e+00> : vector<256x32xf32>
    %6 = tpu.matmul %2, %4, %cst {dimension_numbers = #tpu.dot_dimension_numbers<[1], [0], [0], [1], [0, 0, 1, 1], [], []>} : vector<256x8xf32>, vector<8x32xf32>, vector<256x32xf32> -> vector<256x32xf32>
    %7 = vector.broadcast %1 : vector<256x1xf32> to vector<256x32xf32>
    %8 = arith.mulf %6, %7 : vector<256x32xf32>
    %9 = arith.truncf %8 : vector<256x32xf32> to vector<256x32xbf16>
    %cst_11 = arith.constant dense<0.000000e+00> : vector<256x32xf32>
    %10 = tpu.matmul %0, %9, %cst_11 {dimension_numbers = #tpu.dot_dimension_numbers<[1], [0], [0], [1], [0, 0, 1, 1], [], []>} : vector<256x256xbf16>, vector<256x32xbf16>, vector<256x32xf32> -> vector<256x32xf32>
    %11 = vector.broadcast %1 : vector<256x1xf32> to vector<256x32xf32>
    %12 = arith.mulf %10, %11 : vector<256x32xf32>
    %13 = vector.broadcast %5 : vector<1x32xf32> to vector<256x32xf32>
    %14 = arith.addf %12, %13 : vector<256x32xf32>
    %cst_12 = arith.constant 0.000000e+00 : f32
    %15 = vector.broadcast %cst_12 : f32 to vector<256x32xf32>
    %16 = arith.maximumf %14, %15 : vector<256x32xf32>
    %c0_13 = arith.constant 0 : index
    %c0_14 = arith.constant 0 : index
    %17 = vector.load %arg6[%c0_13, %c0_14] : memref<32x32xf32, #tpu.memory_space<vmem>>, vector<32x32xf32>
    %c0_15 = arith.constant 0 : index
    %c0_16 = arith.constant 0 : index
    %18 = vector.load %arg7[%c0_15, %c0_16] : memref<1x32xf32, #tpu.memory_space<vmem>>, vector<1x32xf32>
    %cst_17 = arith.constant dense<0.000000e+00> : vector<256x32xf32>
    %19 = tpu.matmul %16, %17, %cst_17 {dimension_numbers = #tpu.dot_dimension_numbers<[1], [0], [0], [1], [0, 0, 1, 1], [], []>} : vector<256x32xf32>, vector<32x32xf32>, vector<256x32xf32> -> vector<256x32xf32>
    %20 = vector.broadcast %1 : vector<256x1xf32> to vector<256x32xf32>
    %21 = arith.mulf %19, %20 : vector<256x32xf32>
    %22 = arith.truncf %21 : vector<256x32xf32> to vector<256x32xbf16>
    %cst_18 = arith.constant dense<0.000000e+00> : vector<256x32xf32>
    %23 = tpu.matmul %0, %22, %cst_18 {dimension_numbers = #tpu.dot_dimension_numbers<[1], [0], [0], [1], [0, 0, 1, 1], [], []>} : vector<256x256xbf16>, vector<256x32xbf16>, vector<256x32xf32> -> vector<256x32xf32>
    %24 = vector.broadcast %1 : vector<256x1xf32> to vector<256x32xf32>
    %25 = arith.mulf %23, %24 : vector<256x32xf32>
    %26 = vector.broadcast %18 : vector<1x32xf32> to vector<256x32xf32>
    %27 = arith.addf %25, %26 : vector<256x32xf32>
    %cst_19 = arith.constant 0.000000e+00 : f32
    %28 = vector.broadcast %cst_19 : f32 to vector<256x32xf32>
    %29 = arith.maximumf %27, %28 : vector<256x32xf32>
    %30 = tpu.iota {dimensions = array<i32: 0>} : vector<2x256xi32>
    %31 = vector.broadcast %3 : vector<1x256xi32> to vector<2x256xi32>
    %32 = arith.cmpi eq, %31, %30 : vector<2x256xi32>
    %33 = arith.extui %32 : vector<2x256xi1> to vector<2x256xi32>
    %34 = arith.sitofp %33 : vector<2x256xi32> to vector<2x256xf32>
    %cst_20 = arith.constant dense<0.000000e+00> : vector<2x32xf32>
    %35 = tpu.matmul %34, %29, %cst_20 {dimension_numbers = #tpu.dot_dimension_numbers<[1], [0], [0], [1], [0, 0, 1, 1], [], []>} : vector<2x256xf32>, vector<256x32xf32>, vector<2x32xf32> -> vector<2x32xf32>
    %c0_21 = arith.constant 0 : index
    %c0_22 = arith.constant 0 : index
    %36 = vector.load %arg8[%c0_21, %c0_22] : memref<32x4xf32, #tpu.memory_space<vmem>>, vector<32x4xf32>
    %cst_23 = arith.constant dense<0.000000e+00> : vector<2x4xf32>
    %37 = tpu.matmul %35, %36, %cst_23 {dimension_numbers = #tpu.dot_dimension_numbers<[1], [0], [0], [1], [0, 0, 1, 1], [], []>} : vector<2x32xf32>, vector<32x4xf32>, vector<2x4xf32> -> vector<2x4xf32>
    %c0_24 = arith.constant 0 : index
    %c0_25 = arith.constant 0 : index
    %38 = vector.load %arg9[%c0_24, %c0_25] : memref<1x4xf32, #tpu.memory_space<vmem>>, vector<1x4xf32>
    %39 = vector.broadcast %38 : vector<1x4xf32> to vector<2x4xf32>
    %40 = arith.addf %37, %39 : vector<2x4xf32>
    %c0_26 = arith.constant 0 : index
    %c0_27 = arith.constant 0 : index
    %41 = vector.load %arg10[%c0_26, %c0_27] : memref<2x4xf32, #tpu.memory_space<vmem>>, vector<2x4xf32>
    tpu.vector_store %arg10[%c0_26, %c0_27], %40 {strides = array<i32>} : memref<2x4xf32, #tpu.memory_space<vmem>>, vector<2x4xf32>,
    return
  }
}

</mosaic_0001>

<bundles_post_ra>
// kernel: tpu_custom_call.1
= control target key start
LH: loop header
LB: loop body
LE: loop exit
PB: predicated region body
PF: predicated region fallthrough
CT: control target
= control target key end

     0   :  { %vm135_vm0 = vcmask 64512   ;;  %v1898_v2 = vmov 0   ;;  %s2987_s0 = inlined_call_operand.vmem [shape: bf16[256,256], index: 0, kind: input, shape index: {}]   ;;  %s2988_s1 = inlined_call_operand.vmem [shape: f32[256,1], index: 1, kind: input, shape index: {}]   ;;  %s2989_s2 = inlined_call_operand.vmem [shape: s32[1,256], index: 2, kind: input, shape index: {}]   ;;  %s2990_s3 = inlined_call_operand.vmem [shape: f32[256,8], index: 3, kind: input, shape index: {}]   ;;  %s2991_s4 = inlined_call_operand.vmem [shape: f32[8,32], index: 4, kind: input, shape index: {}]   ;;  %s2992_s5 = inlined_call_operand.vmem [shape: f32[1,32], index: 5, kind: input, shape index: {}]   ;;  %s2993_s6 = inlined_call_operand.vmem [shape: f32[32,32], index: 6, kind: input, shape index: {}]   ;;  %s2994_s7 = inlined_call_operand.vmem [shape: f32[1,32], index: 7, kind: input, shape index: {}]   ;;  %s2995_s8 = inlined_call_operand.vmem [shape: f32[32,4], index: 8, kind: input, shape index: {}]   ;;  %s2996_s9 = inlined_call_operand.vmem [shape: f32[1,4], index: 9, kind: input, shape index: {}]   ;;  %s2997_s10 = inlined_call_operand.hbm [shape: f32[2,4], index: 10, kind: output, shape index: {}]  }
   0x1   :  { %v133_v0 = vld [vmem:[%s2991_s4] sm:$0xff]  ;;  %1868 = vset.pattern.permute.xlu2 %v1898_v2  ;;  %1867 = vset.pattern.permute.xlu1 %v1898_v2  ;;  %v118_v3 = vld [vmem:[%s2990_s3 + $0x90] sm:$0xff]  ;;  %v101_v7 = vld [vmem:[%s2990_s3 + $0x8] sm:$0xff] }
   0x2   :  { %v100_v1 = vld [vmem:[%s2990_s3] sm:$0xff]  ;;  %v98_v4 = vld [vmem:[%s2988_s1 + $0xf0] sm:$0xff]  ;;  %1866 = vset.pattern.permute.xlu0 %v1898_v2  ;;  %247 = vmatpush.msra.mxu0 %v133_v0  ;;  %v119_v8 = vld [vmem:[%s2990_s3 + $0x98] sm:$0xff] }
   0x3   :  { %v96_v5 = vld [vmem:[%s2988_s1 + $0xe0] sm:$0xff]  ;;  %v82_v6 = vld [vmem:[%s2988_s1 + $0x70] sm:$0xff]  ;;  %1858 = vmatpush.msra.mxu1 %v133_v0  ;;  %1629 = vmatmul.msk.f32.vlgmr.msra.gmra.mxu0 %vm135_vm0, %v100_v1  ;;  %v99_v9 = vld [vmem:[%s2988_s1 + $0xf8] sm:$0xff] }
   0x4   :  { %1647 = vmatmul.msk.f32.vlgmr.msra.gmra.mxu1 %vm135_vm0, %v118_v3  ;;  %497 = vperm.xlu0 %1866, %v98_v4   ;;  %v97_v10 = vld [vmem:[%s2988_s1 + $0xe8] sm:$0xff]  ;;  %v83_v11 = vld [vmem:[%s2988_s1 + $0x78] sm:$0xff] }
   0x5   :  { %487 = vperm.xlu1 %1867, %v96_v5   ;;  %417 = vperm.xlu2 %1868, %v82_v6  }
   0x6   :  { %15 = vsyncpa [#allocation3], 0  ;;  %v102_v12 = vld [vmem:[%s2990_s3 + $0x10] sm:$0xff]  ;;  %v120_v13 = vld [vmem:[%s2990_s3 + $0xa0] sm:$0xff]  ;;  %vm995_vm1 = vcmask 261120   ;;  %s1900_s22 = smov [#allocation2]  }
   0x7   :  { %v94_v14 = vld [vmem:[%s2988_s1 + $0xd0] sm:$0xff]  ;;  %v95_v15 = vld [vmem:[%s2988_s1 + $0xd8] sm:$0xff]  ;;  %v80_v16 = vld [vmem:[%s2988_s1 + $0x60] sm:$0xff]  ;;  %s1618_s23 = sshll.u32 %s1900_s22, 4  ;;  %vm1611_vm4 = vcmask 25600   ;;  %s1619_s23 = int_to_ptr.vmem [resolvable:$true] %s1618_s23 }
   0x8   :  { %v103_v17 = vld [vmem:[%s2990_s3 + $0x18] sm:$0xff]  ;;  %v121_v18 = vld [vmem:[%s2990_s3 + $0xa8] sm:$0xff]  ;;  %v92_v20 = vld [vmem:[%s2988_s1 + $0xc0] sm:$0xff] }
   0x9   :  { %v81_v19 = vld [vmem:[%s2988_s1 + $0x68] sm:$0xff]  ;;  %v104_v22 = vld [vmem:[%s2990_s3 + $0x20] sm:$0xff]  ;;  %v122_v23 = vld [vmem:[%s2990_s3 + $0xb0] sm:$0xff] }
   0xa   :  { %v93_v21 = vld [vmem:[%s2988_s1 + $0xc8] sm:$0xff]  ;;  %v78_v24 = vld [vmem:[%s2988_s1 + $0x50] sm:$0xff]  ;;  %v79_v26 = vld [vmem:[%s2988_s1 + $0x58] sm:$0xff] }
   0xb   :  { %1630 = vmatmul.msk.f32.gmra.mxu0 %vm135_vm0, %v101_v7  ;;  %v90_v25 = vld [vmem:[%s2988_s1 + $0xb0] sm:$0xff]  ;;  %v105_v27 = vld [vmem:[%s2990_s3 + $0x28] sm:$0xff]  ;;  %v123_v28 = vld [vmem:[%s2990_s3 + $0xb8] sm:$0xff] }
   0xc   :  { %1648 = vmatmul.msk.f32.gmra.mxu1 %vm135_vm0, %v119_v8  ;;  %502 = vperm.xlu0 %1866, %v99_v9   ;;  %v91_v29 = vld [vmem:[%s2988_s1 + $0xb8] sm:$0xff]  ;;  %v77_v30 = vld [vmem:[%s2988_s1 + $0x48] sm:$0xff]  ;;  %v76_v31 = vld [vmem:[%s2988_s1 + $0x40] sm:$0xff] }
   0xd   :  { %492 = vperm.xlu1 %1867, %v97_v10   ;;  %422 = vperm.xlu2 %1868, %v83_v11   ;;  %v106_v32 = vld [vmem:[%s2990_s3 + $0x30] sm:$0xff]  ;;  %v124_v33 = vld [vmem:[%s2990_s3 + $0xc0] sm:$0xff]  ;;  %v89_v35 = vld [vmem:[%s2988_s1 + $0xa8] sm:$0xff] }
   0xe   :  { %v88_v34 = vld [vmem:[%s2988_s1 + $0xa0] sm:$0xff]  ;;  %v74_v36 = vld [vmem:[%s2988_s1 + $0x30] sm:$0xff]  ;;  %v107_v37 = vld [vmem:[%s2990_s3 + $0x38] sm:$0xff] }
   0xf   :  { %v125_v38 = vld [vmem:[%s2990_s3 + $0xc8] sm:$0xff]  ;;  %v75_v39 = vld [vmem:[%s2988_s1 + $0x38] sm:$0xff]  ;;  %v86_v40 = vld [vmem:[%s2988_s1 + $0x90] sm:$0xff] }
  0x10   :  { %v87_v41 = vld [vmem:[%s2988_s1 + $0x98] sm:$0xff]  ;;  %v108_v42 = vld [vmem:[%s2990_s3 + $0x40] sm:$0xff]  ;;  %v126_v43 = vld [vmem:[%s2990_s3 + $0xd0] sm:$0xff] }
  0x11   :  { %v72_v44 = vld [vmem:[%s2988_s1 + $0x20] sm:$0xff]  ;;  %v73_v46 = vld [vmem:[%s2988_s1 + $0x28] sm:$0xff]  ;;  %v127_v48 = vld [vmem:[%s2990_s3 + $0xd8] sm:$0xff] }
  0x12   :  { %v84_v45 = vld [vmem:[%s2988_s1 + $0x80] sm:$0xff]  ;;  %v109_v47 = vld [vmem:[%s2990_s3 + $0x48] sm:$0xff]  ;;  %v71_v50 = vld [vmem:[%s2988_s1 + $0x18] sm:$0xff] }
  0x13   :  { %1631 = vmatmul.msk.f32.gmra.mxu0 %vm135_vm0, %v102_v12  ;;  %v85_v49 = vld [vmem:[%s2988_s1 + $0x88] sm:$0xff]  ;;  %v70_v51 = vld [vmem:[%s2988_s1 + $0x10] sm:$0xff]  ;;  %v128_v53 = vld [vmem:[%s2990_s3 + $0xe0] sm:$0xff] }
  0x14   :  { %1649 = vmatmul.msk.f32.gmra.mxu1 %vm135_vm0, %v120_v13  ;;  %477 = vperm.xlu0 %1866, %v94_v14   ;;  %v110_v52 = vld [vmem:[%s2990_s3 + $0x50] sm:$0xff]  ;;  %v68_v54 = vld [vmem:[%s2988_s1] sm:$0xff]  ;;  %v69_v55 = vld [vmem:[%s2988_s1 + $0x8] sm:$0xff] }
  0x15   :  { %482 = vperm.xlu1 %1867, %v95_v15   ;;  %407 = vperm.xlu2 %1868, %v80_v16   ;;  %v111_v56 = vld [vmem:[%s2990_s3 + $0x58] sm:$0xff]  ;;  %v129_v57 = vld [vmem:[%s2990_s3 + $0xe8] sm:$0xff]  ;;  %v112_v58 = vld [vmem:[%s2990_s3 + $0x60] sm:$0xff] }
  0x16   :  { %v130_v59 = vld [vmem:[%s2990_s3 + $0xf0] sm:$0xff]  ;;  %v113_v60 = vld [vmem:[%s2990_s3 + $0x68] sm:$0xff]  ;;  %v131_v61 = vld [vmem:[%s2990_s3 + $0xf8] sm:$0xff] }
  0x17   :  { %v114_v62 = vld [vmem:[%s2990_s3 + $0x70] sm:$0xff]  ;;  %v115_v63 = vld [vmem:[%s2990_s3 + $0x78] sm:$0xff]  ;;  %v116_v1 = vld [vmem:[%s2990_s3 + $0x80] sm:$0xff] }
  0x18   :  { %v117_v4 = vld [vmem:[%s2990_s3 + $0x88] sm:$0xff] }
  0x1b   :  { %1632 = vmatmul.msk.f32.gmra.mxu0 %vm135_vm0, %v103_v17 }
  0x1c   :  { %1650 = vmatmul.msk.f32.gmra.mxu1 %vm135_vm0, %v121_v18  ;;  %412 = vperm.xlu0 %1866, %v81_v19  }
  0x1d   :  { %467 = vperm.xlu1 %1867, %v92_v20   ;;  %472 = vperm.xlu2 %1868, %v93_v21  }
  0x23   :  { %1633 = vmatmul.msk.f32.gmra.mxu0 %vm135_vm0, %v104_v22 }
  0x24   :  { %1651 = vmatmul.msk.f32.gmra.mxu1 %vm135_vm0, %v122_v23  ;;  %397 = vperm.xlu0 %1866, %v78_v24  }
  0x25   :  { %457 = vperm.xlu2 %1868, %v90_v25   ;;  %402 = vperm.xlu1 %1867, %v79_v26  }
  0x2b   :  { %1634 = vmatmul.msk.f32.gmra.mxu0 %vm135_vm0, %v105_v27 }
  0x2c   :  { %1652 = vmatmul.msk.f32.gmra.mxu1 %vm135_vm0, %v123_v28  ;;  %462 = vperm.xlu0 %1866, %v91_v29  }
  0x2d   :  { %392 = vperm.xlu2 %1868, %v77_v30   ;;  %387 = vperm.xlu1 %1867, %v76_v31  }
  0x33   :  { %1635 = vmatmul.msk.f32.gmra.mxu0 %vm135_vm0, %v106_v32 }
  0x34   :  { %1653 = vmatmul.msk.f32.gmra.mxu1 %vm135_vm0, %v124_v33  ;;  %447 = vperm.xlu0 %1866, %v88_v34  }
  0x35   :  { %452 = vperm.xlu1 %1867, %v89_v35   ;;  %377 = vperm.xlu2 %1868, %v74_v36  }
  0x3b   :  { %1636 = vmatmul.msk.f32.gmra.mxu0 %vm135_vm0, %v107_v37 }
  0x3c   :  { %1654 = vmatmul.msk.f32.gmra.mxu1 %vm135_vm0, %v125_v38  ;;  %382 = vperm.xlu0 %1866, %v75_v39  }
  0x3d   :  { %437 = vperm.xlu1 %1867, %v86_v40   ;;  %442 = vperm.xlu2 %1868, %v87_v41  }
  0x43   :  { %1637 = vmatmul.msk.f32.gmra.mxu0 %vm135_vm0, %v108_v42 }
  0x44   :  { %1655 = vmatmul.msk.f32.gmra.mxu1 %vm135_vm0, %v126_v43  ;;  %367 = vperm.xlu0 %1866, %v72_v44  }
  0x45   :  { %427 = vperm.xlu2 %1868, %v84_v45   ;;  %372 = vperm.xlu1 %1867, %v73_v46  }
  0x4b   :  { %1638 = vmatmul.msk.f32.gmra.mxu0 %vm135_vm0, %v109_v47 }
  0x4c   :  { %1656 = vmatmul.msk.f32.gmra.mxu1 %vm135_vm0, %v127_v48  ;;  %432 = vperm.xlu0 %1866, %v85_v49  }
  0x4d   :  { %362 = vperm.xlu2 %1868, %v71_v50   ;;  %357 = vperm.xlu1 %1867, %v70_v51  }
  0x53   :  { %1639 = vmatmul.msk.f32.gmra.mxu0 %vm135_vm0, %v110_v52 }
  0x54   :  { %1657 = vmatmul.msk.f32.gmra.mxu1 %vm135_vm0, %v128_v53  ;;  %347 = vperm.xlu0 %1866, %v68_v54  }
  0x55   :  { %352 = vperm.xlu1 %1867, %v69_v55  }
  0x5b   :  { %1640 = vmatmul.msk.f32.gmra.mxu0 %vm135_vm0, %v111_v56 }
  0x5c   :  { %1658 = vmatmul.msk.f32.gmra.mxu1 %vm135_vm0, %v129_v57 }
  0x5f   :  { %v2209_v18 = vpop.permute.xlu2 %417 }
  0x63   :  { %1641 = vmatmul.msk.f32.gmra.mxu0 %vm135_vm0, %v112_v58 }
  0x64   :  { %1659 = vmatmul.msk.f32.gmra.mxu1 %vm135_vm0, %v130_v59 }
  0x67   :  { %v2217_v23 = vpop.permute.xlu2 %422 }
  0x6b   :  { %1642 = vmatmul.msk.f32.gmra.mxu0 %vm135_vm0, %v113_v60 }
  0x6c   :  { %1660 = vmatmul.msk.f32.gmra.mxu1 %vm135_vm0, %v131_v61 }
  0x6f   :  { %v2225_v28 = vpop.permute.xlu2 %407 }
  0x73   :  { %1643 = vmatmul.msk.f32.gmra.mxu0 %vm135_vm0, %v114_v62 }
  0x76   :  { %v2203_v14 = vpop.permute.xlu0 %497 }
  0x77   :  { %v2205_v15 = vpop.permute.xlu1 %487  ;;  %v2233_v35 = vpop.permute.xlu2 %472 }
  0x7b   :  { %1644 = vmatmul.msk.f32.gmra.mxu0 %vm135_vm0, %v115_v63 }
  0x7e   :  { %v2211_v19 = vpop.permute.xlu0 %502 }
  0x7f   :  { %v2213_v20 = vpop.permute.xlu1 %492  ;;  %v2239_v40 = vpop.permute.xlu2 %457 }
  0x80   :  { %v2175_v0 = vpop.f32.mrf.mxu0 }
  0x81   :  { %v2180_v2 = vpop.f32.mrf.mxu1 }
  0x83   :  { %1645 = vmatmul.msk.f32.gmra.mxu0 %vm135_vm0, %v116_v1 }
  0x86   :  { %v2219_v24 = vpop.permute.xlu0 %477 }
  0x87   :  { %v2221_v25 = vpop.permute.xlu1 %482  ;;  %v2245_v45 = vpop.permute.xlu2 %392 }
  0x88   :  { %v2183_v3 = vpop.f32.mrf.mxu0 }
  0x89   :  { %v2188_v5 = vpop.f32.mrf.mxu1 }
  0x8b   :  { %1646 = vmatmul.msk.f32.gmra.mxu0 %vm135_vm0, %v117_v4 }
  0x8e   :  { %v2229_v30 = vpop.permute.xlu0 %412 }
  0x8f   :  { %v2231_v32 = vpop.permute.xlu1 %467  ;;  %v2255_v55 = vpop.permute.xlu2 %377 }
  0x90   :  { %v2191_v6 = vpop.f32.mrf.mxu0 }
  0x91   :  { %v2193_v7 = vpop.f32.mrf.mxu1 }
  0x96   :  { %v2235_v36 = vpop.permute.xlu0 %397 }
  0x97   :  { %v2237_v37 = vpop.permute.xlu1 %402 }
  0x98   :  { %v2195_v8 = vpop.f32.mrf.mxu0 }
  0x99   :  { %v2197_v9 = vpop.f32.mrf.mxu1 }
  0x9e   :  { %v2241_v41 = vpop.permute.xlu0 %462 }
  0x9f   :  { %v2243_v42 = vpop.permute.xlu1 %387 }
  0xa0   :  { %v2199_v10 = vpop.f32.mrf.mxu0 }
  0xa1   :  { %v315_v11 = vpop.f32.mrf.mxu1 }
  0xa2   :  { %v527_v4 = vmul.f32 %v2239_v40, %v315_v11 }
  0xa6   :  { %v2247_v46 = vpop.permute.xlu0 %447 }
  0xa7   :  { %v2249_v47 = vpop.permute.xlu1 %452  ;;  %v525_v11 = vmul.f32 %v2247_v46, %v2193_v7 }
  0xa8   :  { %v2201_v12 = vpop.f32.mrf.mxu0 }
  0xa9   :  { %v318_v13 = vpop.f32.mrf.mxu1 }
  0xae   :  { %v2260_v60 = vpop.permute.xlu0 %382 }
  0xaf   :  { %v2258_v59 = vpop.permute.xlu1 %437 }
  0xb0   :  { %v2207_v16 = vpop.f32.mrf.mxu0 }
  0xb1   :  { %v321_v17 = vpop.f32.mrf.mxu1 }
  0xb2   :  { %v529_v62 = vmul.f32 %v2231_v32, %v321_v17 }
  0xb8   :  { %v2215_v21 = vpop.f32.mrf.mxu0 }
  0xb9   :  { %v324_v22 = vpop.f32.mrf.mxu1 }
  0xba   :  { %v530_v63 = vmul.f32 %v2233_v35, %v324_v22  ;;  %v2274_v22 = vpop.permute.xlu0 %367 }
  0xc0   :  { %v2223_v26 = vpop.f32.mrf.mxu0 }
  0xc1   :  { %v327_v27 = vpop.f32.mrf.mxu1 }
  0xc2   :  { %v531_v61 = vmul.f32 %v2219_v24, %v327_v27 }
  0xc8   :  { %v2227_v29 = vpop.f32.mrf.mxu0 }
  0xc9   :  { %v330_v31 = vpop.f32.mrf.mxu1 }
  0xca   :  { %v532_v56 = vmul.f32 %v2221_v25, %v330_v31 }
  0xcc   :  { %v550_v1 = vpack.c.bf16 %v532_v56, %v531_v61 }
  0xd0   :  { %v279_v33 = vpop.f32.mrf.mxu0 }
  0xd1   :  { %v333_v34 = vpop.f32.mrf.mxu1  ;;  %v515_v61 = vmul.f32 %v2235_v36, %v279_v33  ;;  %v512_v33 = vmul.f32 %v2260_v60, %v2215_v21 }
  0xd2   :  { %v533_v54 = vmul.f32 %v2205_v15, %v333_v34  ;;  %v528_v34 = vmul.f32 %v2241_v41, %v318_v13  ;;  %v526_v13 = vmul.f32 %v2249_v47, %v2197_v9  ;;  %v514_v9 = vmul.f32 %v2245_v45, %v2227_v29 }
  0xd3   :  { %v511_v29 = vmul.f32 %v2255_v55, %v2207_v16 }
  0xd8   :  { %v282_v38 = vpop.f32.mrf.mxu0 }
  0xd9   :  { %v336_v39 = vpop.f32.mrf.mxu1 }
  0xda   :  { %v534_v52 = vmul.f32 %v2213_v20, %v336_v39  ;;  %v549_v39 = vpack.c.bf16 %v530_v63, %v529_v62  ;;  %v513_v63 = vmul.f32 %v2243_v42, %v2223_v26  ;;  %v1826_v26 = vld [vmem:[%s2987_s0 + $0x4] sm:$0xf] }
  0xdc   :  { %v551_v58 = vpack.c.bf16 %v534_v52, %v533_v54  ;;  %v548_v52 = vpack.c.bf16 %v528_v34, %v527_v4  ;;  %v516_v54 = vmul.f32 %v2237_v37, %v282_v38 }
  0xe0   :  { %v285_v43 = vpop.f32.mrf.mxu0 }
  0xe1   :  { %v339_v44 = vpop.f32.mrf.mxu1 }
  0xe2   :  { %v535_v50 = vmul.f32 %v2203_v14, %v339_v44 }
  0xe8   :  { %v288_v48 = vpop.f32.mrf.mxu0 }
  0xe9   :  { %v342_v49 = vpop.f32.mrf.mxu1  ;;  %v518_v27 = vmul.f32 %v2229_v30, %v288_v48 }
  0xea   :  { %v536_v51 = vmul.f32 %v2211_v19, %v342_v49 }
  0xec   :  { %v552_v53 = vpack.c.bf16 %v536_v51, %v535_v50  ;;  %v2269_v50 = vpop.permute.xlu2 %442  ;;  %v2272_v51 = vpop.permute.xlu1 %372 }
  0xed   :  { %v524_v7 = vmul.f32 %v2269_v50, %v2188_v5  ;;  %v541_v5 = vpack.c.bf16 %v514_v9, %v513_v63  ;;  %v510_v16 = vmul.f32 %v2272_v51, %v2201_v12 }
  0xee   :  { %802 = vmatpush.bf16.msra.mxu2 %v552_v53  ;;  %v517_v53 = vmul.f32 %v2225_v28, %v285_v43  ;;  %v542_v43 = vpack.c.bf16 %v516_v54, %v515_v61  ;;  %v1671_v61 = vld [vmem:[%s2987_s0 + $0x10] sm:$0xf] }
  0xf0   :  { %v291_v57 = vpop.f32.mrf.mxu0  ;;  %v543_v56 = vpack.c.bf16 %v518_v27, %v517_v53 }
  0xf1   :  { %v519_v44 = vmul.f32 %v2209_v18, %v291_v57  ;;  %v547_v57 = vpack.c.bf16 %v526_v13, %v525_v11 }
  0xf2   :  { %803 = vmatpush.bf16.msra.mxu2 %v551_v58  ;;  %v523_v58 = vmul.f32 %v2258_v59, %v2180_v2 }
  0xf4   :  { %v2289_v62 = vpop.permute.xlu2 %427  ;;  %v546_v38 = vpack.c.bf16 %v524_v7, %v523_v58  ;;  %v2295_v2 = vpop.permute.xlu1 %357  ;;  %v1829_v7 = vld [vmem:[%s2987_s0 + $0x14] sm:$0xf0] }
  0xf5   :  { %3032 = vst [vmem:[#allocation5_spill] sm:$0xff] %v2295_v2  ;;  %v507_v11 = vmul.f32 %v2295_v2, %v2191_v6  ;;  %v1663_v6 = vld [vmem:[%s2987_s0] sm:$0xf]  ;;  %v2354_v9 = vor.u32 %v1829_v7, %v1671_v61 }
  0xf6   :  { %804 = vmatpush.bf16.msra.mxu2 %v550_v1  ;;  %v2293_v1 = vpop.permute.xlu0 %432  ;;  %v1711_v7 = vld [vmem:[%s2987_s0 + $0x60] sm:$0xf] }
  0xf8   :  { %v294_v31 = vpop.f32.mrf.mxu0 }
  0xf9   :  { %v520_v49 = vmul.f32 %v2217_v23, %v294_v31 }
  0xfa   :  { %805 = vmatpush.bf16.msra.mxu2 %v549_v39  ;;  %v1665_v39 = vld [vmem:[%s2987_s0 + $0x8] sm:$0xf0] }
  0xfb   :  { %v544_v17 = vpack.c.bf16 %v520_v49, %v519_v44  ;;  %v540_v44 = vpack.c.bf16 %v512_v33, %v511_v29  ;;  %v509_v49 = vmul.f32 %v2274_v22, %v2199_v10  ;;  %v2313_v27 = vor.u32 %v1826_v26, %v1665_v39  ;;  %v1679_v33 = vld [vmem:[%s2987_s0 + $0x20] sm:$0xf]  ;;  %v1832_v29 = vld [vmem:[%s2987_s0 + $0x34] sm:$0xf]  ;;  %v1687_v26 = vld [vmem:[%s2987_s0 + $0x30] sm:$0xf] }
  0xfc   :  { %v2319_v13 = vpop.permute.xlu1 %352  ;;  %v1833_v39 = vld [vmem:[%s2987_s0 + $0x34] sm:$0xf0] }
  0xfd   :  { %713 = vmatpush.bf16.msrb.mxu1 %v544_v17  ;;  %3033 = vst [vmem:[#allocation6_spill] sm:$0xff] %v2313_v27  ;;  %v2315_v17 = vpop.permute.xlu2 %362 }
  0xfe   :  { %806 = vmatpush.bf16.msra.mxu2 %v548_v52  ;;  %3034 = vst [vmem:[#allocation7_spill] sm:$0xff] %v2315_v17  ;;  %v539_v52 = vpack.c.bf16 %v510_v16, %v509_v49  ;;  %v2321_v53 = vpop.permute.xlu0 %347  ;;  %v508_v10 = vmul.f32 %v2315_v17, %v2195_v8  ;;  %v1697_v49 = vld [vmem:[%s2987_s0 + $0x48] sm:$0xf0] }
  0xff   :  { %3035 = vst [vmem:[#allocation8_spill] sm:$0xff] %v2319_v13  ;;  %v505_v54 = vmul.f32 %v2321_v53, %v2175_v0  ;;  %v1828_v0 = vld [vmem:[%s2987_s0 + $0x14] sm:$0xf] }
 0x100   :  { %v297_v48 = vpop.f32.mrf.mxu0  ;;  %3036 = vst [vmem:[#allocation9_spill] sm:$0xff] %v2321_v53  ;;  %v538_v12 = vpack.c.bf16 %v508_v10, %v507_v11  ;;  %v1835_v11 = vld [vmem:[%s2987_s0 + $0x44] sm:$0xf0] }
 0x101   :  { %714 = vmatpush.bf16.msrb.mxu1 %v543_v56  ;;  %v521_v34 = vmul.f32 %v2289_v62, %v297_v48  ;;  %v506_v56 = vmul.f32 %v2319_v13, %v2183_v3  ;;  %v1827_v48 = vld [vmem:[%s2987_s0 + $0x4] sm:$0xf0]  ;;  %v1673_v3 = vld [vmem:[%s2987_s0 + $0x18] sm:$0xf0] }
 0x102   :  { %807 = vmatpush.bf16.msra.mxu2 %v547_v57  ;;  %v2336_v58 = vor.u32 %v1827_v48, %v1663_v6  ;;  %v2345_v8 = vor.u32 %v1828_v0, %v1673_v3  ;;  %v1703_v6 = vld [vmem:[%s2987_s0 + $0x50] sm:$0xf]  ;;  %v1837_v48 = vld [vmem:[%s2987_s0 + $0x54] sm:$0xf0]  ;;  %v1838_v0 = vld [vmem:[%s2987_s0 + $0x64] sm:$0xf] }
 0x103   :  { %v537_v57 = vpack.c.bf16 %v506_v56, %v505_v54  ;;  %v1705_v54 = vld [vmem:[%s2987_s0 + $0x58] sm:$0xf0]  ;;  %v1713_v3 = vld [vmem:[%s2987_s0 + $0x68] sm:$0xf0] }
 0x104   :  { %3037 = vst [vmem:[#allocation10_spill] sm:$0xff] %v2345_v8  ;;  %v2435_v61 = vor.u32 %v1838_v0, %v1713_v3  ;;  %v1844_v3 = vld [vmem:[%s2987_s0 + $0x94] sm:$0xf] }
 0x105   :  { %715 = vmatpush.bf16.msrb.mxu1 %v542_v43  ;;  %v1830_v43 = vld [vmem:[%s2987_s0 + $0x24] sm:$0xf] }
 0x106   :  { %808 = vmatpush.bf16.msra.mxu2 %v546_v38  ;;  %v1681_v38 = vld [vmem:[%s2987_s0 + $0x28] sm:$0xf0]  ;;  %3046 = vst [vmem:[#allocation19_spill] sm:$0xff] %v2435_v61 }
 0x107   :  { %v2363_v63 = vor.u32 %v1830_v43, %v1681_v38  ;;  %v1839_v43 = vld [vmem:[%s2987_s0 + $0x64] sm:$0xf0] }
 0x108   :  { %v300_v4 = vpop.f32.mrf.mxu0  ;;  %v2444_v38 = vor.u32 %v1839_v43, %v1711_v7  ;;  %v1737_v7 = vld [vmem:[%s2987_s0 + $0x98] sm:$0xf0] }
 0x109   :  { %v522_v31 = vmul.f32 %v2293_v1, %v300_v4  ;;  %716 = vmatpush.bf16.msrb.mxu1 %v541_v5  ;;  %3038 = vst [vmem:[#allocation11_spill] sm:$0xff] %v2363_v63  ;;  %v1831_v5 = vld [vmem:[%s2987_s0 + $0x24] sm:$0xf0] }
 0x10a   :  { %v2372_v4 = vor.u32 %v1831_v5, %v1679_v33  ;;  %3047 = vst [vmem:[#allocation20_spill] sm:$0xff] %v2444_v38  ;;  %v1840_v33 = vld [vmem:[%s2987_s0 + $0x74] sm:$0xf]  ;;  %v1721_v5 = vld [vmem:[%s2987_s0 + $0x78] sm:$0xf0] }
 0x10b   :  { %v545_v21 = vpack.c.bf16 %v522_v31, %v521_v34  ;;  %v1689_v34 = vld [vmem:[%s2987_s0 + $0x38] sm:$0xf0] }
 0x10c   :  { %3039 = vst [vmem:[#allocation12_spill] sm:$0xff] %v2372_v4  ;;  %v2381_v31 = vor.u32 %v1832_v29, %v1689_v34  ;;  %v2453_v29 = vor.u32 %v1840_v33, %v1721_v5  ;;  %v1719_v34 = vld [vmem:[%s2987_s0 + $0x70] sm:$0xf]  ;;  %v2494_v5 = vor.u32 %v1844_v3, %v1737_v7 }
 0x10d   :  { %717 = vmatpush.bf16.msrb.mxu1 %v540_v44  ;;  %809 = vmatpush.bf16.msra.mxu2 %v545_v21  ;;  %v2390_v44 = vor.u32 %v1833_v39, %v1687_v26  ;;  %v1834_v21 = vld [vmem:[%s2987_s0 + $0x44] sm:$0xf]  ;;  %v1841_v26 = vld [vmem:[%s2987_s0 + $0x74] sm:$0xf0] }
 0x10e   :  { %3040 = vst [vmem:[#allocation13_spill] sm:$0xff] %v2381_v31  ;;  %v2399_v16 = vor.u32 %v1834_v21, %v1697_v49  ;;  %v2462_v39 = vor.u32 %v1841_v26, %v1719_v34  ;;  %v1842_v21 = vld [vmem:[%s2987_s0 + $0x84] sm:$0xf]  ;;  %v1729_v49 = vld [vmem:[%s2987_s0 + $0x88] sm:$0xf0] }
 0x10f   :  { %3041 = vst [vmem:[#allocation14_spill] sm:$0xff] %v2390_v44 }
 0x110   :  { %810 = vmatmul.bf16.vlgmr.msra.gmra.mxu2 %v2313_v27  ;;  %3042 = vst [vmem:[#allocation15_spill] sm:$0xff] %v2399_v16 }
 0x111   :  { %718 = vmatpush.bf16.msrb.mxu1 %v539_v52  ;;  %v1695_v52 = vld [vmem:[%s2987_s0 + $0x40] sm:$0xf]  ;;  %3048 = vst [vmem:[#allocation21_spill] sm:$0xff] %v2453_v29 }
 0x112   :  { %v2408_v10 = vor.u32 %v1835_v11, %v1695_v52  ;;  %3049 = vst [vmem:[#allocation22_spill] sm:$0xff] %v2462_v39  ;;  %v2471_v52 = vor.u32 %v1842_v21, %v1729_v49  ;;  %v993_v11 = vld [vmem:[%s2993_s6 + $0x18] sm:$0xff]  ;;  %v1735_v49 = vld [vmem:[%s2987_s0 + $0x90] sm:$0xf] }
 0x113   :  { %1104 = vmatpush.msrb.mxu2 %v993_v11  ;;  %1859 = vmatpush.msra.mxu3 %v993_v11  ;;  %3052 = vst [vmem:[#allocation25_spill] sm:$0xff] %v2494_v5  ;;  %v1845_v11 = vld [vmem:[%s2987_s0 + $0x94] sm:$0xf0] }
 0x114   :  { %3043 = vst [vmem:[#allocation16_spill] sm:$0xff] %v2408_v10 }
 0x115   :  { %719 = vmatpush.bf16.msrb.mxu1 %v538_v12  ;;  %v1836_v12 = vld [vmem:[%s2987_s0 + $0x54] sm:$0xf]  ;;  %3050 = vst [vmem:[#allocation23_spill] sm:$0xff] %v2471_v52 }
 0x116   :  { %v2417_v56 = vor.u32 %v1836_v12, %v1705_v54  ;;  %v1727_v54 = vld [vmem:[%s2987_s0 + $0x80] sm:$0xf] }
 0x118   :  { %3044 = vst [vmem:[#allocation17_spill] sm:$0xff] %v2417_v56 }
 0x119   :  { %720 = vmatpush.bf16.msrb.mxu1 %v537_v57  ;;  %v2426_v57 = vor.u32 %v1837_v48, %v1703_v6  ;;  %v1843_v6 = vld [vmem:[%s2987_s0 + $0x84] sm:$0xf0] }
 0x11a   :  { %v2483_v48 = vor.u32 %v1843_v6, %v1727_v54  ;;  %v1846_v6 = vld [vmem:[%s2987_s0 + $0xa4] sm:$0xf] }
 0x11b   :  { %3045 = vst [vmem:[#allocation18_spill] sm:$0xff] %v2426_v57 }
 0x11c   :  { %721 = vmatmul.bf16.vlgmr.msrb.gmra.mxu1 %v2336_v58  ;;  %3051 = vst [vmem:[#allocation24_spill] sm:$0xff] %v2483_v48 }
 0x120   :  { %815 = vmatmul.bf16.gmra.mxu2 %v2345_v8 }
 0x12c   :  { %726 = vmatmul.bf16.gmra.mxu1 %v2354_v9 }
 0x130   :  { %820 = vmatmul.bf16.gmra.mxu2 %v2363_v63 }
 0x13c   :  { %731 = vmatmul.bf16.gmra.mxu1 %v2372_v4 }
 0x140   :  { %825 = vmatmul.bf16.gmra.mxu2 %v2381_v31 }
 0x14c   :  { %736 = vmatmul.bf16.gmra.mxu1 %v2390_v44 }
 0x150   :  { %830 = vmatmul.bf16.gmra.mxu2 %v2399_v16 }
 0x15c   :  { %741 = vmatmul.bf16.gmra.mxu1 %v2408_v10  ;;  %v1783_v10 = vld [vmem:[%s2987_s0 + $0xf0] sm:$0xf] }
 0x160   :  { %835 = vmatmul.bf16.gmra.mxu2 %v2417_v56  ;;  %v1853_v56 = vld [vmem:[%s2987_s0 + $0xd4] sm:$0xf0] }
 0x16c   :  { %746 = vmatmul.bf16.gmra.mxu1 %v2426_v57 }
 0x170   :  { %840 = vmatmul.bf16.gmra.mxu2 %v2435_v61 }
 0x17c   :  { %751 = vmatmul.bf16.gmra.mxu1 %v2444_v38 }
 0x180   :  { %845 = vmatmul.bf16.gmra.mxu2 %v2453_v29 }
 0x18c   :  { %756 = vmatmul.bf16.gmra.mxu1 %v2462_v39 }
 0x190   :  { %850 = vmatmul.bf16.gmra.mxu2 %v2471_v52 }
 0x193   :  { %v811_v12 = vpop.f32.mrf.mxu2 }
 0x199   :  { %v722_v0 = vpop.f32.mrf.mxu1 }
 0x19a   :  { %v2491_v43 = vadd.f32 %v811_v12, %v722_v0  ;;  %v2505_v12 = vor.u32 %v1845_v11, %v1735_v49  ;;  %v1745_v0 = vld [vmem:[%s2987_s0 + $0xa8] sm:$0xf0] }
 0x19b   :  { %v813_v33 = vpop.f32.mrf.mxu2 }
 0x19c   :  { %761 = vmatmul.bf16.gmra.mxu1 %v2483_v48  ;;  %3053 = vst [vmem:[#allocation26_spill] sm:$0xff] %v2505_v12 }
 0x1a0   :  { %855 = vmatmul.bf16.gmra.mxu2 %v2494_v5  ;;  %v1743_v5 = vld [vmem:[%s2987_s0 + $0xa0] sm:$0xf] }
 0x1a1   :  { %v724_v34 = vpop.f32.mrf.mxu1 }
 0x1a2   :  { %v2497_v26 = vadd.f32 %v813_v33, %v724_v34  ;;  %v2516_v33 = vor.u32 %v1846_v6, %v1745_v0  ;;  %v1848_v6 = vld [vmem:[%s2987_s0 + $0xb4] sm:$0xf]  ;;  %v1753_v0 = vld [vmem:[%s2987_s0 + $0xb8] sm:$0xf0] }
 0x1a3   :  { %v816_v21 = vpop.f32.mrf.mxu2 }
 0x1a4   :  { %3054 = vst [vmem:[#allocation27_spill] sm:$0xff] %v2516_v33 }
 0x1a9   :  { %v727_v54 = vpop.f32.mrf.mxu1 }
 0x1aa   :  { %v2513_v3 = vadd.f32 %v816_v21, %v727_v54  ;;  %v1847_v21 = vld [vmem:[%s2987_s0 + $0xa4] sm:$0xf0] }
 0x1ab   :  { %v818_v7 = vpop.f32.mrf.mxu2  ;;  %v2527_v54 = vor.u32 %v1847_v21, %v1743_v5 }
 0x1ac   :  { %766 = vmatmul.bf16.gmra.mxu1 %v2505_v12  ;;  %v1751_v12 = vld [vmem:[%s2987_s0 + $0xb0] sm:$0xf] }
 0x1ad   :  { %3055 = vst [vmem:[#allocation28_spill] sm:$0xff] %v2527_v54 }
 0x1b0   :  { %860 = vmatmul.bf16.gmra.mxu2 %v2516_v33  ;;  %v2538_v33 = vor.u32 %v1848_v6, %v1753_v0  ;;  %v1850_v6 = vld [vmem:[%s2987_s0 + $0xc4] sm:$0xf]  ;;  %v1761_v0 = vld [vmem:[%s2987_s0 + $0xc8] sm:$0xf0] }
 0x1b1   :  { %v729_v34 = vpop.f32.mrf.mxu1 }
 0x1b2   :  { %v2519_v49 = vadd.f32 %v818_v7, %v729_v34  ;;  %3056 = vst [vmem:[#allocation29_spill] sm:$0xff] %v2538_v33 }
 0x1b3   :  { %v821_v11 = vpop.f32.mrf.mxu2 }
 0x1b9   :  { %v732_v52 = vpop.f32.mrf.mxu1 }
 0x1ba   :  { %v2535_v7 = vadd.f32 %v821_v11, %v732_v52  ;;  %v1849_v52 = vld [vmem:[%s2987_s0 + $0xb4] sm:$0xf0] }
 0x1bb   :  { %v823_v34 = vpop.f32.mrf.mxu2  ;;  %v2549_v11 = vor.u32 %v1849_v52, %v1751_v12  ;;  %v992_v12 = vld [vmem:[%s2993_s6 + $0x10] sm:$0xff] }
 0x1bc   :  { %771 = vmatmul.bf16.gmra.mxu1 %v2527_v54  ;;  %1105 = vmatpush.msrb.mxu2 %v992_v12 }
 0x1bd   :  { %3057 = vst [vmem:[#allocation30_spill] sm:$0xff] %v2549_v11  ;;  %1860 = vmatpush.msra.mxu3 %v992_v12  ;;  %v1852_v12 = vld [vmem:[%s2987_s0 + $0xd4] sm:$0xf] }
 0x1c0   :  { %865 = vmatmul.bf16.gmra.mxu2 %v2538_v33  ;;  %v2560_v33 = vor.u32 %v1850_v6, %v1761_v0 }
 0x1c1   :  { %v734_v5 = vpop.f32.mrf.mxu1 }
 0x1c2   :  { %v2541_v21 = vadd.f32 %v823_v34, %v734_v5  ;;  %3058 = vst [vmem:[#allocation31_spill] sm:$0xff] %v2560_v33 }
 0x1c3   :  { %v826_v29 = vpop.f32.mrf.mxu2 }
 0x1c9   :  { %v737_v61 = vpop.f32.mrf.mxu1 }
 0x1ca   :  { %v2557_v34 = vadd.f32 %v826_v29, %v737_v61  ;;  %v1759_v61 = vld [vmem:[%s2987_s0 + $0xc0] sm:$0xf]  ;;  %v1851_v29 = vld [vmem:[%s2987_s0 + $0xc4] sm:$0xf0] }
 0x1cb   :  { %v828_v5 = vpop.f32.mrf.mxu2  ;;  %v2576_v6 = vor.u32 %v1851_v29, %v1759_v61 }
 0x1cc   :  { %776 = vmatmul.bf16.gmra.mxu1 %v2549_v11  ;;  %v1767_v11 = vld [vmem:[%s2987_s0 + $0xd0] sm:$0xf] }
 0x1cd   :  { %3059 = vst [vmem:[#allocation32_spill] sm:$0xff] %v2576_v6  ;;  %v2600_v39 = vor.u32 %v1853_v56, %v1767_v11  ;;  %v991_v56 = vld [vmem:[%s2993_s6 + $0x8] sm:$0xff]  ;;  %v990_v11 = vld [vmem:[%s2993_s6] sm:$0xff]  ;;  %s1620_s6 = sshll.u32 %s2997_s10, 4  ;;  %s1621_s6 = int_to_ptr.hbm [resolvable:$true] %s1620_s6 }
 0x1ce   :  { %1106 = vmatpush.msrb.mxu2 %v991_v56  ;;  %1861 = vmatpush.msra.mxu3 %v991_v56  ;;  %v1856_v56 = vld [vmem:[%s2987_s0 + $0xf4] sm:$0xf] }
 0x1cf   :  { %3061 = vst [vmem:[#allocation34_spill] sm:$0xff] %v2600_v39 }
 0x1d0   :  { %870 = vmatmul.bf16.gmra.mxu2 %v2560_v33  ;;  %1862 = vmatpush.msra.mxu3 %v990_v11 }
 0x1d1   :  { %v739_v52 = vpop.f32.mrf.mxu1  ;;  %1107 = vmatpush.msrb.mxu2 %v990_v11 }
 0x1d2   :  { %v2566_v54 = vadd.f32 %v828_v5, %v739_v52  ;;  %v1769_v5 = vld [vmem:[%s2987_s0 + $0xd8] sm:$0xf0] }
 0x1d3   :  { %v2568_v48 = vpop.f32.mrf.mxu2  ;;  %v2589_v33 = vor.u32 %v1852_v12, %v1769_v5  ;;  %v1854_v12 = vld [vmem:[%s2987_s0 + $0xe4] sm:$0xf]  ;;  %v1777_v5 = vld [vmem:[%s2987_s0 + $0xe8] sm:$0xf0] }
 0x1d4   :  { %v2611_v38 = vor.u32 %v1854_v12, %v1777_v5  ;;  %v1775_v12 = vld [vmem:[%s2987_s0 + $0xe0] sm:$0xf]  ;;  %v1855_v5 = vld [vmem:[%s2987_s0 + $0xe4] sm:$0xf0] }
 0x1d5   :  { %3060 = vst [vmem:[#allocation33_spill] sm:$0xff] %v2589_v33  ;;  %v2628_v31 = vor.u32 %v1855_v5, %v1775_v12 }
 0x1d6   :  { %3062 = vst [vmem:[#allocation35_spill] sm:$0xff] %v2611_v38 }
 0x1d7   :  { %3063 = vst [vmem:[#allocation36_spill] sm:$0xff] %v2628_v31 }
 0x1d9   :  { %v2578_v0 = vpop.f32.mrf.mxu1 }
 0x1db   :  { %v2586_v52 = vpop.f32.mrf.mxu2 }
 0x1dc   :  { %781 = vmatmul.bf16.gmra.mxu1 %v2576_v6 }
 0x1e0   :  { %875 = vmatmul.bf16.gmra.mxu2 %v2589_v33 }
 0x1e1   :  { %v2592_v61 = vpop.f32.mrf.mxu1 }
 0x1e3   :  { %v836_v29 = vpop.f32.mrf.mxu2 }
 0x1e9   :  { %v747_v16 = vpop.f32.mrf.mxu1 }
 0x1ea   :  { %v2608_v33 = vadd.f32 %v836_v29, %v747_v16 }
 0x1eb   :  { %v838_v6 = vpop.f32.mrf.mxu2 }
 0x1ec   :  { %786 = vmatmul.bf16.gmra.mxu1 %v2600_v39 }
 0x1f0   :  { %880 = vmatmul.bf16.gmra.mxu2 %v2611_v38 }
 0x1f1   :  { %v749_v16 = vpop.f32.mrf.mxu1 }
 0x1f2   :  { %v2620_v29 = vadd.f32 %v838_v6, %v749_v16  ;;  %v1785_v6 = vld [vmem:[%s2987_s0 + $0xf8] sm:$0xf0] }
 0x1f3   :  { %v841_v39 = vpop.f32.mrf.mxu2  ;;  %v2639_v38 = vor.u32 %v1856_v56, %v1785_v6  ;;  %v2655_v56 = vld [vmem:[%s2992_s5] ss:$0 sm:$0xff] }
 0x1f5   :  { %3064 = vst [vmem:[#allocation37_spill] sm:$0xff] %v2639_v38 }
 0x1f9   :  { %v752_v57 = vpop.f32.mrf.mxu1 }
 0x1fa   :  { %v2636_v11 = vadd.f32 %v841_v39, %v752_v57  ;;  %v1857_v57 = vld [vmem:[%s2987_s0 + $0xf4] sm:$0xf0]  ;;  %v891_v39 = vmul.f32 %v2491_v43, %v2321_v53  ;;  %v892_v43 = vmul.f32 %v2497_v26, %v2319_v13 }
 0x1fb   :  { %v843_v16 = vpop.f32.mrf.mxu2  ;;  %v2657_v6 = vor.u32 %v1857_v57, %v1783_v10 }
 0x1fc   :  { %791 = vmatmul.bf16.gmra.mxu1 %v2628_v31  ;;  %v927_v4 = vadd.f32 %v2655_v56, %v892_v43 }
 0x1fd   :  { %3065 = vst [vmem:[#allocation38_spill] sm:$0xff] %v2657_v6 }
 0x200   :  { %885 = vmatmul.bf16.gmra.mxu2 %v2639_v38 }
 0x201   :  { %v754_v12 = vpop.f32.mrf.mxu1 }
 0x202   :  { %v2642_v5 = vadd.f32 %v843_v16, %v754_v12  ;;  %v926_v12 = vadd.f32 %v2655_v56, %v891_v39 }
 0x203   :  { %v846_v63 = vpop.f32.mrf.mxu2 }
 0x204   :  { %v958_v44 = vmax.f32 %v926_v12, 0.0  ;;  %v893_v12 = vmul.f32 %v2513_v3, %v2295_v2 }
 0x209   :  { %v757_v16 = vpop.f32.mrf.mxu1 }
 0x20a   :  { %v847_v38 = vadd.f32 %v846_v63, %v757_v16  ;;  %v959_v16 = vmax.f32 %v927_v4, 0.0  ;;  %v894_v4 = vmul.f32 %v2519_v49, %v2315_v17 }
 0x20b   :  { %v848_v31 = vpop.f32.mrf.mxu2 }
 0x20c   :  { %v905_v8 = vmul.f32 %v847_v38, %v2209_v18  ;;  %796 = vmatmul.bf16.gmra.mxu1 %v2657_v6 }
 0x20e   :  { %v940_v27 = vadd.f32 %v2655_v56, %v905_v8 }
 0x210   :  { %1789 = vmatmul.msk.f32.vlgmr.msrb.gmra.mxu2 %vm995_vm1, %v958_v44  ;;  %v972_v10 = vmax.f32 %v940_v27, 0.0  ;;  %v928_v27 = vadd.f32 %v2655_v56, %v893_v12 }
 0x211   :  { %v759_v57 = vpop.f32.mrf.mxu1 }
 0x212   :  { %v849_v39 = vadd.f32 %v848_v31, %v759_v57  ;;  %1803 = vmatmul.msk.f32.vlgmr.msra.gmra.mxu3 %vm995_vm1, %v972_v10  ;;  %v960_v10 = vmax.f32 %v928_v27, 0.0 }
 0x213   :  { %v851_v63 = vpop.f32.mrf.mxu2 }
 0x214   :  { %v906_v38 = vmul.f32 %v849_v39, %v2217_v23 }
 0x216   :  { %v941_v26 = vadd.f32 %v2655_v56, %v906_v38  ;;  %v929_v38 = vadd.f32 %v2655_v56, %v894_v4 }
 0x218   :  { %1790 = vmatmul.msk.f32.gmra.mxu2 %vm995_vm1, %v959_v16  ;;  %v973_v8 = vmax.f32 %v941_v26, 0.0  ;;  %v961_v26 = vmax.f32 %v929_v38, 0.0 }
 0x219   :  { %v762_v44 = vpop.f32.mrf.mxu1 }
 0x21a   :  { %v852_v6 = vadd.f32 %v851_v63, %v762_v44  ;;  %1804 = vmatmul.msk.f32.gmra.mxu3 %vm995_vm1, %v973_v8 }
 0x21b   :  { %v853_v31 = vpop.f32.mrf.mxu2 }
 0x21c   :  { %v907_v43 = vmul.f32 %v852_v6, %v2289_v62  ;;  %v895_v6 = vmul.f32 %v2535_v7, %v2274_v22 }
 0x21e   :  { %v942_v3 = vadd.f32 %v2655_v56, %v907_v43  ;;  %v930_v27 = vadd.f32 %v2655_v56, %v895_v6  ;;  %v897_v6 = vmul.f32 %v2557_v34, %v2255_v55 }
 0x220   :  { %1791 = vmatmul.msk.f32.gmra.mxu2 %vm995_vm1, %v960_v10  ;;  %v974_v57 = vmax.f32 %v942_v3, 0.0  ;;  %v962_v4 = vmax.f32 %v930_v27, 0.0  ;;  %v896_v3 = vmul.f32 %v2541_v21, %v2272_v51 }
 0x221   :  { %v764_v39 = vpop.f32.mrf.mxu1 }
 0x222   :  { %v854_v16 = vadd.f32 %v853_v31, %v764_v39  ;;  %1805 = vmatmul.msk.f32.gmra.mxu3 %vm995_vm1, %v974_v57  ;;  %v931_v38 = vadd.f32 %v2655_v56, %v896_v3 }
 0x223   :  { %v856_v63 = vpop.f32.mrf.mxu2 }
 0x224   :  { %v908_v12 = vmul.f32 %v854_v16, %v2293_v1 }
 0x226   :  { %v943_v49 = vadd.f32 %v2655_v56, %v908_v12 }
 0x228   :  { %1792 = vmatmul.msk.f32.gmra.mxu2 %vm995_vm1, %v961_v26  ;;  %v975_v8 = vmax.f32 %v943_v49, 0.0  ;;  %v963_v26 = vmax.f32 %v931_v38, 0.0 }
 0x229   :  { %v767_v44 = vpop.f32.mrf.mxu1 }
 0x22a   :  { %v857_v43 = vadd.f32 %v856_v63, %v767_v44  ;;  %1806 = vmatmul.msk.f32.gmra.mxu3 %vm995_vm1, %v975_v8  ;;  %v932_v44 = vadd.f32 %v2655_v56, %v897_v6 }
 0x22b   :  { %v858_v31 = vpop.f32.mrf.mxu2 }
 0x22c   :  { %v909_v10 = vmul.f32 %v857_v43, %v2258_v59 }
 0x22e   :  { %v944_v7 = vadd.f32 %v2655_v56, %v909_v10  ;;  %v964_v10 = vmax.f32 %v932_v44, 0.0 }
 0x230   :  { %1793 = vmatmul.msk.f32.gmra.mxu2 %vm995_vm1, %v962_v4  ;;  %v976_v57 = vmax.f32 %v944_v7, 0.0  ;;  %v898_v4 = vmul.f32 %v2566_v54, %v2260_v60 }
 0x231   :  { %v769_v39 = vpop.f32.mrf.mxu1 }
 0x232   :  { %v859_v16 = vadd.f32 %v858_v31, %v769_v39  ;;  %1807 = vmatmul.msk.f32.gmra.mxu3 %vm995_vm1, %v976_v57  ;;  %v933_v57 = vadd.f32 %v2655_v56, %v898_v4  ;;  %v832_v39 = vadd.f32 %v2568_v48, %v2578_v0  ;;  %v834_v48 = vadd.f32 %v2586_v52, %v2592_v61 }
 0x233   :  { %v861_v63 = vpop.f32.mrf.mxu2 }
 0x234   :  { %v910_v12 = vmul.f32 %v859_v16, %v2269_v50  ;;  %v899_v54 = vmul.f32 %v832_v39, %v2243_v42 }
 0x236   :  { %v945_v21 = vadd.f32 %v2655_v56, %v910_v12  ;;  %v965_v12 = vmax.f32 %v933_v57, 0.0  ;;  %v901_v57 = vmul.f32 %v2608_v33, %v2235_v36 }
 0x238   :  { %1794 = vmatmul.msk.f32.gmra.mxu2 %vm995_vm1, %v963_v26  ;;  %v977_v49 = vmax.f32 %v945_v21, 0.0 }
 0x239   :  { %v772_v8 = vpop.f32.mrf.mxu1 }
 0x23a   :  { %v862_v27 = vadd.f32 %v861_v63, %v772_v8  ;;  %1808 = vmatmul.msk.f32.gmra.mxu3 %vm995_vm1, %v977_v49  ;;  %v934_v49 = vadd.f32 %v2655_v56, %v899_v54 }
 0x23b   :  { %v863_v43 = vpop.f32.mrf.mxu2 }
 0x23c   :  { %v911_v31 = vmul.f32 %v862_v27, %v2247_v46  ;;  %v966_v27 = vmax.f32 %v934_v49, 0.0 }
 0x23e   :  { %v946_v34 = vadd.f32 %v2655_v56, %v911_v31 }
 0x240   :  { %1795 = vmatmul.msk.f32.gmra.mxu2 %vm995_vm1, %v964_v10  ;;  %v978_v3 = vmax.f32 %v946_v34, 0.0 }
 0x241   :  { %v774_v7 = vpop.f32.mrf.mxu1 }
 0x242   :  { %v864_v38 = vadd.f32 %v863_v43, %v774_v7  ;;  %1809 = vmatmul.msk.f32.gmra.mxu3 %vm995_vm1, %v978_v3  ;;  %v900_v43 = vmul.f32 %v834_v48, %v2245_v45 }
 0x243   :  { %v866_v16 = vpop.f32.mrf.mxu2 }
 0x244   :  { %v912_v63 = vmul.f32 %v864_v38, %v2249_v47  ;;  %v935_v34 = vadd.f32 %v2655_v56, %v900_v43 }
 0x246   :  { %v947_v26 = vadd.f32 %v2655_v56, %v912_v63  ;;  %v967_v7 = vmax.f32 %v935_v34, 0.0  ;;  %v936_v63 = vadd.f32 %v2655_v56, %v901_v57  ;;  %v904_v57 = vmul.f32 %v2642_v5, %v2229_v30 }
 0x248   :  { %1796 = vmatmul.msk.f32.gmra.mxu2 %vm995_vm1, %v965_v12  ;;  %v979_v6 = vmax.f32 %v947_v26, 0.0 }
 0x249   :  { %v777_v21 = vpop.f32.mrf.mxu1 }
 0x24a   :  { %v867_v0 = vadd.f32 %v866_v16, %v777_v21  ;;  %1810 = vmatmul.msk.f32.gmra.mxu3 %vm995_vm1, %v979_v6  ;;  %v968_v6 = vmax.f32 %v936_v63, 0.0  ;;  %v902_v21 = vmul.f32 %v2620_v29, %v2237_v37 }
 0x24b   :  { %v868_v8 = vpop.f32.mrf.mxu2 }
 0x24c   :  { %v913_v44 = vmul.f32 %v867_v0, %v2239_v40  ;;  %v937_v0 = vadd.f32 %v2655_v56, %v902_v21 }
 0x24e   :  { %v948_v31 = vadd.f32 %v2655_v56, %v913_v44  ;;  %v969_v43 = vmax.f32 %v937_v0, 0.0 }
 0x250   :  { %1797 = vmatmul.msk.f32.gmra.mxu2 %vm995_vm1, %v966_v27  ;;  %v980_v10 = vmax.f32 %v948_v31, 0.0  ;;  %v903_v31 = vmul.f32 %v2636_v11, %v2225_v28 }
 0x251   :  { %v779_v4 = vpop.f32.mrf.mxu1 }
 0x252   :  { %v869_v3 = vadd.f32 %v868_v8, %v779_v4  ;;  %1811 = vmatmul.msk.f32.gmra.mxu3 %vm995_vm1, %v980_v10  ;;  %v938_v34 = vadd.f32 %v2655_v56, %v903_v31 }
 0x253   :  { %v871_v52 = vpop.f32.mrf.mxu2 }
 0x254   :  { %v914_v61 = vmul.f32 %v869_v3, %v2241_v41 }
 0x256   :  { %v949_v39 = vadd.f32 %v2655_v56, %v914_v61 }
 0x258   :  { %1798 = vmatmul.msk.f32.gmra.mxu2 %vm995_vm1, %v967_v7  ;;  %v981_v38 = vmax.f32 %v949_v39, 0.0  ;;  %v970_v7 = vmax.f32 %v938_v34, 0.0 }
 0x259   :  { %v782_v16 = vpop.f32.mrf.mxu1 }
 0x25a   :  { %v872_v12 = vadd.f32 %v871_v52, %v782_v16  ;;  %1812 = vmatmul.msk.f32.gmra.mxu3 %vm995_vm1, %v981_v38  ;;  %v939_v16 = vadd.f32 %v2655_v56, %v904_v57 }
 0x25b   :  { %v873_v54 = vpop.f32.mrf.mxu2 }
 0x25c   :  { %v915_v26 = vmul.f32 %v872_v12, %v2231_v32 }
 0x25e   :  { %v950_v33 = vadd.f32 %v2655_v56, %v915_v26  ;;  %v971_v26 = vmax.f32 %v939_v16, 0.0 }
 0x260   :  { %1799 = vmatmul.msk.f32.gmra.mxu2 %vm995_vm1, %v968_v6  ;;  %v982_v49 = vmax.f32 %v950_v33, 0.0 }
 0x261   :  { %v784_v48 = vpop.f32.mrf.mxu1 }
 0x262   :  { %v874_v8 = vadd.f32 %v873_v54, %v784_v48  ;;  %1813 = vmatmul.msk.f32.gmra.mxu3 %vm995_vm1, %v982_v49 }
 0x263   :  { %v876_v44 = vpop.f32.mrf.mxu2 }
 0x264   :  { %v916_v27 = vmul.f32 %v874_v8, %v2233_v35 }
 0x266   :  { %v951_v29 = vadd.f32 %v2655_v56, %v916_v27 }
 0x268   :  { %1800 = vmatmul.msk.f32.gmra.mxu2 %vm995_vm1, %v969_v43  ;;  %v983_v10 = vmax.f32 %v951_v29, 0.0 }
 0x269   :  { %v787_v4 = vpop.f32.mrf.mxu1 }
 0x26a   :  { %v877_v3 = vadd.f32 %v876_v44, %v787_v4  ;;  %1814 = vmatmul.msk.f32.gmra.mxu3 %vm995_vm1, %v983_v10 }
 0x26b   :  { %v878_v52 = vpop.f32.mrf.mxu2 }
 0x26c   :  { %v917_v61 = vmul.f32 %v877_v3, %v2219_v24 }
 0x26e   :  { %v952_v11 = vadd.f32 %v2655_v56, %v917_v61 }
 0x270   :  { %1801 = vmatmul.msk.f32.gmra.mxu2 %vm995_vm1, %v970_v7  ;;  %v984_v39 = vmax.f32 %v952_v11, 0.0 }
 0x271   :  { %v789_v38 = vpop.f32.mrf.mxu1 }
 0x272   :  { %v879_v63 = vadd.f32 %v878_v52, %v789_v38  ;;  %1815 = vmatmul.msk.f32.gmra.mxu3 %vm995_vm1, %v984_v39 }
 0x273   :  { %v881_v12 = vpop.f32.mrf.mxu2 }
 0x274   :  { %v918_v54 = vmul.f32 %v879_v63, %v2221_v25 }
 0x276   :  { %v953_v6 = vadd.f32 %v2655_v56, %v918_v54 }
 0x278   :  { %1802 = vmatmul.msk.f32.gmra.mxu2 %vm995_vm1, %v971_v26  ;;  %v985_v5 = vmax.f32 %v953_v6, 0.0 }
 0x279   :  { %v792_v21 = vpop.f32.mrf.mxu1 }
 0x27a   :  { %v882_v33 = vadd.f32 %v881_v12, %v792_v21  ;;  %1816 = vmatmul.msk.f32.gmra.mxu3 %vm995_vm1, %v985_v5 }
 0x27b   :  { %v883_v49 = vpop.f32.mrf.mxu2 }
 0x27c   :  { %v919_v48 = vmul.f32 %v882_v33, %v2205_v15 }
 0x27e   :  { %v954_v0 = vadd.f32 %v2655_v56, %v919_v48 }
 0x280   :  { %v986_v8 = vmax.f32 %v954_v0, 0.0 }
 0x281   :  { %v794_v44 = vpop.f32.mrf.mxu1 }
 0x282   :  { %v884_v27 = vadd.f32 %v883_v49, %v794_v44  ;;  %1817 = vmatmul.msk.f32.gmra.mxu3 %vm995_vm1, %v986_v8 }
 0x283   :  { %v886_v43 = vpop.f32.mrf.mxu2 }
 0x284   :  { %v920_v31 = vmul.f32 %v884_v27, %v2213_v20 }
 0x286   :  { %v955_v29 = vadd.f32 %v2655_v56, %v920_v31 }
 0x288   :  { %v987_v10 = vmax.f32 %v955_v29, 0.0 }
 0x289   :  { %v797_v4 = vpop.f32.mrf.mxu1 }
 0x28a   :  { %v887_v34 = vadd.f32 %v886_v43, %v797_v4  ;;  %1818 = vmatmul.msk.f32.gmra.mxu3 %vm995_vm1, %v987_v10 }
 0x28b   :  { %v888_v3 = vpop.f32.mrf.mxu2 }
 0x28c   :  { %v921_v52 = vmul.f32 %v887_v34, %v2203_v14 }
 0x28e   :  { %v956_v61 = vadd.f32 %v2655_v56, %v921_v52 }
 0x290   :  { %v988_v7 = vmax.f32 %v956_v61, 0.0 }
 0x291   :  { %v799_v57 = vpop.f32.mrf.mxu1 }
 0x292   :  { %v889_v11 = vadd.f32 %v888_v3, %v799_v57  ;;  %1819 = vmatmul.msk.f32.gmra.mxu3 %vm995_vm1, %v988_v7 }
 0x293   :  { %v1109_v39 = vpop.f32.mrf.mxu2 }
 0x294   :  { %v922_v38 = vmul.f32 %v889_v11, %v2211_v19  ;;  %v1205_v26 = vmul.f32 %v1109_v39, %v2321_v53 }
 0x295   :  { %v1151_v16 = vpop.f32.mrf.mxu3 }
 0x296   :  { %v957_v63 = vadd.f32 %v2655_v56, %v922_v38  ;;  %v1219_v21 = vmul.f32 %v1151_v16, %v2209_v18 }
 0x298   :  { %v989_v12 = vmax.f32 %v957_v63, 0.0 }
 0x29a   :  { %1820 = vmatmul.msk.f32.gmra.mxu3 %vm995_vm1, %v989_v12 }
 0x29b   :  { %v1112_v54 = vpop.f32.mrf.mxu2 }
 0x29c   :  { %v1206_v6 = vmul.f32 %v1112_v54, %v2319_v13 }
 0x29d   :  { %v1154_v5 = vpop.f32.mrf.mxu3 }
 0x29e   :  { %v1220_v33 = vmul.f32 %v1154_v5, %v2217_v23  ;;  %v1237_v49 = vpack.c.bf16 %v1206_v6, %v1205_v26 }
 0x2a0   :  { %v1244_v48 = vpack.c.bf16 %v1220_v33, %v1219_v21 }
 0x2a2   :  { %1253 = vmatpush.bf16.msrb.mxu0 %v1244_v48 }
 0x2a3   :  { %v1115_v0 = vpop.f32.mrf.mxu2 }
 0x2a4   :  { %v1207_v44 = vmul.f32 %v1115_v0, %v2295_v2 }
 0x2a5   :  { %v2774_v8 = vpop.f32.mrf.mxu3 }
 0x2ab   :  { %v1118_v56 = vpop.f32.mrf.mxu2 }
 0x2ac   :  { %v1208_v27 = vmul.f32 %v1118_v56, %v2315_v17 }
 0x2ad   :  { %v2778_v43 = vpop.f32.mrf.mxu3 }
 0x2ae   :  { %v1238_v31 = vpack.c.bf16 %v1208_v27, %v1207_v44 }
 0x2b3   :  { %v1121_v29 = vpop.f32.mrf.mxu2 }
 0x2b4   :  { %v1209_v34 = vmul.f32 %v1121_v29, %v2274_v22 }
 0x2b5   :  { %v2780_v10 = vpop.f32.mrf.mxu3 }
 0x2bb   :  { %v1124_v4 = vpop.f32.mrf.mxu2 }
 0x2bc   :  { %v1210_v3 = vmul.f32 %v1124_v4, %v2272_v51 }
 0x2bd   :  { %v2784_v52 = vpop.f32.mrf.mxu3 }
 0x2be   :  { %v1239_v61 = vpack.c.bf16 %v1210_v3, %v1209_v34 }
 0x2c3   :  { %v1127_v7 = vpop.f32.mrf.mxu2 }
 0x2c5   :  { %v1169_v57 = vpop.f32.mrf.mxu3 }
 0x2cb   :  { %v1130_v11 = vpop.f32.mrf.mxu2 }
 0x2cc   :  { %v1212_v2 = vmul.f32 %v1130_v11, %v2260_v60 }
 0x2cd   :  { %v1172_v39 = vpop.f32.mrf.mxu3 }
 0x2d3   :  { %v1133_v38 = vpop.f32.mrf.mxu2 }
 0x2d4   :  { %v1213_v53 = vmul.f32 %v1133_v38, %v2243_v42 }
 0x2d5   :  { %v1175_v16 = vpop.f32.mrf.mxu3 }
 0x2db   :  { %v1136_v63 = vpop.f32.mrf.mxu2 }
 0x2dc   :  { %v1214_v34 = vmul.f32 %v1136_v63, %v2245_v45 }
 0x2dd   :  { %v1178_v12 = vpop.f32.mrf.mxu3 }
 0x2de   :  { %v1241_v17 = vpack.c.bf16 %v1214_v34, %v1213_v53  ;;  %v3067_v34 = vld [vmem:[#allocation6_spill] sm:$0xff] }
 0x2e3   :  { %v1139_v54 = vpop.f32.mrf.mxu2 }
 0x2e4   :  { %v1215_v4 = vmul.f32 %v1139_v54, %v2235_v36 }
 0x2e5   :  { %v1181_v26 = vpop.f32.mrf.mxu3 }
 0x2eb   :  { %v1142_v6 = vpop.f32.mrf.mxu2 }
 0x2ec   :  { %v1216_v27 = vmul.f32 %v1142_v6, %v2237_v37 }
 0x2ed   :  { %v1184_v5 = vpop.f32.mrf.mxu3 }
 0x2ee   :  { %v1242_v3 = vpack.c.bf16 %v1216_v27, %v1215_v4 }
 0x2f3   :  { %v1145_v21 = vpop.f32.mrf.mxu2 }
 0x2f4   :  { %v1217_v0 = vmul.f32 %v1145_v21, %v2225_v28  ;;  %v1211_v21 = vmul.f32 %v1127_v7, %v2255_v55 }
 0x2f5   :  { %v1187_v33 = vpop.f32.mrf.mxu3 }
 0x2fb   :  { %v1148_v48 = vpop.f32.mrf.mxu2 }
 0x2fc   :  { %v1218_v56 = vmul.f32 %v1148_v48, %v2229_v30  ;;  %v1240_v48 = vpack.c.bf16 %v1212_v2, %v1211_v21  ;;  %v3071_v21 = vld [vmem:[#allocation11_spill] sm:$0xff] }
 0x2fd   :  { %v1190_v44 = vpop.f32.mrf.mxu3 }
 0x2fe   :  { %v1243_v29 = vpack.c.bf16 %v1218_v56, %v1217_v0  ;;  %v1232_v2 = vmul.f32 %v1190_v44, %v2221_v25  ;;  %v1228_v56 = vmul.f32 %v1178_v12, %v2241_v41  ;;  %v1226_v44 = vmul.f32 %v1172_v39, %v2249_v47  ;;  %v3066_v39 = vld [vmem:[#allocation12_spill] sm:$0xff] }
 0x300   :  { %1254 = vmatpush.bf16.msrb.mxu0 %v1243_v29 }
 0x304   :  { %1255 = vmatpush.bf16.msrb.mxu0 %v1242_v3  ;;  %v3069_v3 = vld [vmem:[#allocation10_spill] sm:$0xff] }
 0x305   :  { %v1193_v13 = vpop.f32.mrf.mxu3 }
 0x306   :  { %v1233_v7 = vmul.f32 %v1193_v13, %v2205_v15  ;;  %v1227_v13 = vmul.f32 %v1175_v16, %v2239_v40  ;;  %v1221_v16 = vmul.f32 %v2774_v8, %v2289_v62  ;;  %v3074_v8 = vld [vmem:[#allocation20_spill] sm:$0xff] }
 0x308   :  { %1256 = vmatpush.bf16.msrb.mxu0 %v1241_v17  ;;  %v1248_v29 = vpack.c.bf16 %v1228_v56, %v1227_v13 }
 0x30c   :  { %1257 = vmatpush.bf16.msrb.mxu0 %v1240_v48  ;;  %v3073_v48 = vld [vmem:[#allocation13_spill] sm:$0xff] }
 0x30d   :  { %v1196_v6 = vpop.f32.mrf.mxu3 }
 0x30e   :  { %v1234_v11 = vmul.f32 %v1196_v6, %v2213_v20  ;;  %v3075_v6 = vld [vmem:[#allocation15_spill] sm:$0xff] }
 0x310   :  { %1258 = vmatpush.bf16.msrb.mxu0 %v1239_v61  ;;  %v1251_v17 = vpack.c.bf16 %v1234_v11, %v1233_v7  ;;  %v1229_v61 = vmul.f32 %v1181_v26, %v2231_v32  ;;  %v1223_v26 = vmul.f32 %v2780_v10, %v2258_v59  ;;  %v3070_v10 = vld [vmem:[#allocation16_spill] sm:$0xff]  ;;  %v3079_v11 = vld [vmem:[#allocation19_spill] sm:$0xff]  ;;  %v3080_v7 = vld [vmem:[#allocation26_spill] sm:$0xff] }
 0x314   :  { %1259 = vmatpush.bf16.msrb.mxu0 %v1238_v31  ;;  %v1231_v31 = vmul.f32 %v1187_v33, %v2219_v24  ;;  %v1225_v33 = vmul.f32 %v1169_v57, %v2247_v46 }
 0x315   :  { %v1199_v54 = vpop.f32.mrf.mxu3 }
 0x316   :  { %v1235_v38 = vmul.f32 %v1199_v54, %v2203_v14  ;;  %v1247_v4 = vpack.c.bf16 %v1226_v44, %v1225_v33  ;;  %v3076_v54 = vld [vmem:[#allocation22_spill] sm:$0xff] }
 0x317   :  { %v3084_v44 = vld [vmem:[#allocation30_spill] sm:$0xff] }
 0x318   :  { %1260 = vmatpush.bf16.msrb.mxu0 %v1237_v49  ;;  %v1230_v49 = vmul.f32 %v1184_v5, %v2233_v35  ;;  %v1224_v5 = vmul.f32 %v2784_v52, %v2269_v50  ;;  %v3068_v52 = vld [vmem:[#allocation14_spill] sm:$0xff] }
 0x31a   :  { %v1249_v27 = vpack.c.bf16 %v1230_v49, %v1229_v61  ;;  %v1246_v12 = vpack.c.bf16 %v1224_v5, %v1223_v26  ;;  %v3082_v49 = vld [vmem:[#allocation28_spill] sm:$0xff]  ;;  %v3083_v61 = vld [vmem:[#allocation23_spill] sm:$0xff] }
 0x31b   :  { %1261 = vmatmul.bf16.vlgmr.msrb.gmra.mxu0 %v2336_v58  ;;  %v1250_v58 = vpack.c.bf16 %v1232_v2, %v1231_v31 }
 0x31d   :  { %v1202_v63 = vpop.f32.mrf.mxu3 }
 0x31e   :  { %v1236_v0 = vmul.f32 %v1202_v63, %v2211_v19  ;;  %v3077_v63 = vld [vmem:[#allocation17_spill] sm:$0xff] }
 0x320   :  { %v1252_v53 = vpack.c.bf16 %v1236_v0, %v1235_v38  ;;  %v3078_v38 = vld [vmem:[#allocation24_spill] sm:$0xff] }
 0x322   :  { %1342 = vmatpush.bf16.msrb.mxu3 %v1252_v53 }
 0x326   :  { %1343 = vmatpush.bf16.msrb.mxu3 %v1251_v17  ;;  %v3081_v17 = vld [vmem:[#allocation21_spill] sm:$0xff] }
 0x32a   :  { %1344 = vmatpush.bf16.msrb.mxu3 %v1250_v58 }
 0x32b   :  { %1266 = vmatmul.bf16.gmra.mxu0 %v2354_v9  ;;  %v1222_v9 = vmul.f32 %v2778_v43, %v2293_v1  ;;  %v3072_v43 = vld [vmem:[#allocation18_spill] sm:$0xff] }
 0x32d   :  { %v1245_v57 = vpack.c.bf16 %v1222_v9, %v1221_v16  ;;  %v3086_v16 = vld [vmem:[#allocation32_spill] sm:$0xff] }
 0x32e   :  { %1345 = vmatpush.bf16.msrb.mxu3 %v1249_v27 }
 0x332   :  { %1346 = vmatpush.bf16.msrb.mxu3 %v1248_v29 }
 0x336   :  { %1347 = vmatpush.bf16.msrb.mxu3 %v1247_v4  ;;  %v3085_v4 = vld [vmem:[#allocation25_spill] sm:$0xff] }
 0x33a   :  { %1348 = vmatpush.bf16.msrb.mxu3 %v1246_v12 }
 0x33b   :  { %1271 = vmatmul.bf16.gmra.mxu0 %v3066_v39 }
 0x33e   :  { %1349 = vmatpush.bf16.msrb.mxu3 %v1245_v57 }
 0x341   :  { %1350 = vmatmul.bf16.vlgmr.msrb.gmra.mxu3 %v3067_v34 }
 0x34b   :  { %1276 = vmatmul.bf16.gmra.mxu0 %v3068_v52  ;;  %v3087_v52 = vld [vmem:[#allocation27_spill] sm:$0xff] }
 0x351   :  { %1355 = vmatmul.bf16.gmra.mxu3 %v3069_v3 }
 0x35b   :  { %1281 = vmatmul.bf16.gmra.mxu0 %v3070_v10 }
 0x361   :  { %1360 = vmatmul.bf16.gmra.mxu3 %v3071_v21 }
 0x36b   :  { %1286 = vmatmul.bf16.gmra.mxu0 %v3072_v43  ;;  %v3088_v43 = vld [vmem:[#allocation34_spill] sm:$0xff] }
 0x371   :  { %1365 = vmatmul.bf16.gmra.mxu3 %v3073_v48 }
 0x37b   :  { %1291 = vmatmul.bf16.gmra.mxu0 %v3074_v8 }
 0x381   :  { %1370 = vmatmul.bf16.gmra.mxu3 %v3075_v6 }
 0x38b   :  { %1296 = vmatmul.bf16.gmra.mxu0 %v3076_v54  ;;  %v3089_v54 = vld [vmem:[#allocation29_spill] sm:$0xff] }
 0x391   :  { %1375 = vmatmul.bf16.gmra.mxu3 %v3077_v63 }
 0x398   :  { %v1262_v0 = vpop.f32.mrf.mxu0 }
 0x39b   :  { %1301 = vmatmul.bf16.gmra.mxu0 %v3078_v38 }
 0x3a0   :  { %v1264_v53 = vpop.f32.mrf.mxu0 }
 0x3a1   :  { %1380 = vmatmul.bf16.gmra.mxu3 %v3079_v11  ;;  %v3090_v11 = vld [vmem:[#allocation36_spill] sm:$0xff] }
 0x3a8   :  { %v1267_v2 = vpop.f32.mrf.mxu0 }
 0x3ab   :  { %1306 = vmatmul.bf16.gmra.mxu0 %v3080_v7 }
 0x3b0   :  { %v1269_v31 = vpop.f32.mrf.mxu0 }
 0x3b1   :  { %1385 = vmatmul.bf16.gmra.mxu3 %v3081_v17  ;;  %v3091_v17 = vld [vmem:[#allocation31_spill] sm:$0xff] }
 0x3b8   :  { %v1272_v58 = vpop.f32.mrf.mxu0 }
 0x3bb   :  { %1311 = vmatmul.bf16.gmra.mxu0 %v3082_v49 }
 0x3c0   :  { %v1274_v13 = vpop.f32.mrf.mxu0 }
 0x3c1   :  { %1390 = vmatmul.bf16.gmra.mxu3 %v3083_v61  ;;  %v3092_v61 = vld [vmem:[#allocation38_spill] sm:$0xff] }
 0x3c4   :  { %v1351_v56 = vpop.f32.mrf.mxu3 }
 0x3c5   :  { %v2834_v27 = vadd.f32 %v1351_v56, %v1262_v0 }
 0x3c8   :  { %v1277_v5 = vpop.f32.mrf.mxu0 }
 0x3cb   :  { %1316 = vmatmul.bf16.gmra.mxu0 %v3084_v44 }
 0x3cc   :  { %v1353_v29 = vpop.f32.mrf.mxu3 }
 0x3cd   :  { %v2837_v33 = vadd.f32 %v1353_v29, %v1264_v53 }
 0x3d0   :  { %v1279_v12 = vpop.f32.mrf.mxu0 }
 0x3d1   :  { %1395 = vmatmul.bf16.gmra.mxu3 %v3085_v4 }
 0x3d4   :  { %v1356_v26 = vpop.f32.mrf.mxu3 }
 0x3d5   :  { %v2840_v9 = vadd.f32 %v1356_v26, %v1267_v2  ;;  %v3094_v26 = vld [vmem:[#allocation35_spill] sm:$0xff] }
 0x3d8   :  { %v1282_v34 = vpop.f32.mrf.mxu0 }
 0x3db   :  { %1321 = vmatmul.bf16.gmra.mxu0 %v3086_v16 }
 0x3dc   :  { %v1358_v39 = vpop.f32.mrf.mxu3 }
 0x3dd   :  { %v2843_v57 = vadd.f32 %v1358_v39, %v1269_v31 }
 0x3e0   :  { %v1284_v21 = vpop.f32.mrf.mxu0 }
 0x3e1   :  { %1400 = vmatmul.bf16.gmra.mxu3 %v3087_v52 }
 0x3e4   :  { %v1361_v3 = vpop.f32.mrf.mxu3 }
 0x3e5   :  { %v2846_v10 = vadd.f32 %v1361_v3, %v1272_v58  ;;  %v3095_v3 = vld [vmem:[#allocation37_spill] sm:$0xff] }
 0x3e8   :  { %v1287_v6 = vpop.f32.mrf.mxu0 }
 0x3eb   :  { %1326 = vmatmul.bf16.gmra.mxu0 %v3088_v43 }
 0x3ec   :  { %v1363_v48 = vpop.f32.mrf.mxu3 }
 0x3ed   :  { %v2849_v8 = vadd.f32 %v1363_v48, %v1274_v13  ;;  %v3093_v13 = vld [vmem:[#allocation33_spill] sm:$0xff] }
 0x3f0   :  { %v1289_v0 = vpop.f32.mrf.mxu0 }
 0x3f1   :  { %1405 = vmatmul.bf16.gmra.mxu3 %v3089_v54 }
 0x3f4   :  { %v1366_v63 = vpop.f32.mrf.mxu3 }
 0x3f5   :  { %v2852_v38 = vadd.f32 %v1366_v63, %v1277_v5 }
 0x3f8   :  { %v1292_v2 = vpop.f32.mrf.mxu0 }
 0x3fb   :  { %1331 = vmatmul.bf16.gmra.mxu0 %v3090_v11 }
 0x3fc   :  { %v1368_v53 = vpop.f32.mrf.mxu3 }
 0x3fd   :  { %v1369_v7 = vadd.f32 %v1368_v53, %v1279_v12 }
 0x400   :  { %v1294_v58 = vpop.f32.mrf.mxu0 }
 0x401   :  { %1410 = vmatmul.bf16.gmra.mxu3 %v3091_v17 }
 0x404   :  { %v1371_v31 = vpop.f32.mrf.mxu3 }
 0x405   :  { %v1372_v49 = vadd.f32 %v1371_v31, %v1282_v34 }
 0x408   :  { %v1297_v44 = vpop.f32.mrf.mxu0 }
 0x40b   :  { %1336 = vmatmul.bf16.gmra.mxu0 %v3092_v61 }
 0x40c   :  { %v1373_v56 = vpop.f32.mrf.mxu3 }
 0x410   :  { %v1299_v4 = vpop.f32.mrf.mxu0 }
 0x411   :  { %1415 = vmatmul.bf16.gmra.mxu3 %v3093_v13 }
 0x414   :  { %v1376_v29 = vpop.f32.mrf.mxu3 }
 0x418   :  { %v1302_v39 = vpop.f32.mrf.mxu0 }
 0x41c   :  { %v1378_v5 = vpop.f32.mrf.mxu3 }
 0x41d   :  { %v1379_v31 = vadd.f32 %v1378_v5, %v1289_v0 }
 0x420   :  { %v1304_v52 = vpop.f32.mrf.mxu0 }
 0x421   :  { %1420 = vmatmul.bf16.gmra.mxu3 %v3094_v26  ;;  %v2866_v26 = vld [vmem:[%s2994_s7] ss:$0 sm:$0xff] }
 0x424   :  { %v1381_v16 = vpop.f32.mrf.mxu3 }
 0x425   :  { %v1382_v11 = vadd.f32 %v1381_v16, %v1292_v2  ;;  %v1374_v16 = vadd.f32 %v1373_v56, %v1284_v21 }
 0x428   :  { %v1307_v48 = vpop.f32.mrf.mxu0 }
 0x42c   :  { %v1383_v12 = vpop.f32.mrf.mxu3 }
 0x42d   :  { %v1384_v54 = vadd.f32 %v1383_v12, %v1294_v58 }
 0x42f   :  { %v1444_v61 = vmul.f32 %v1384_v54, %v2229_v30 }
 0x431   :  { %1425 = vmatmul.bf16.gmra.mxu3 %v3095_v3  ;;  %v1377_v3 = vadd.f32 %v1376_v29, %v1287_v6  ;;  %v1479_v30 = vadd.f32 %v2866_v26, %v1444_v61  ;;  %v1440_v29 = vmul.f32 %v1374_v16, %v2245_v45  ;;  %v1437_v45 = vmul.f32 %v2852_v38, %v2255_v55  ;;  %v3096_v38 = vld [vmem:[#allocation7_spill] sm:$0xff] }
 0x433   :  { %v1475_v54 = vadd.f32 %v2866_v26, %v1440_v29  ;;  %v1472_v55 = vadd.f32 %v2866_v26, %v1437_v45 }
 0x434   :  { %v1386_v43 = vpop.f32.mrf.mxu3 }
 0x435   :  { %v1387_v34 = vadd.f32 %v1386_v43, %v1297_v44  ;;  %v1443_v44 = vmul.f32 %v1382_v11, %v2225_v28  ;;  %v1511_v43 = vmax.f32 %v1479_v30, 0.0  ;;  %v3099_v30 = vld [vmem:[#allocation9_spill] sm:$0xff] }
 0x437   :  { %v1445_v53 = vmul.f32 %v1387_v34, %v2209_v18  ;;  %v1442_v18 = vmul.f32 %v1379_v31, %v2237_v37  ;;  %v1478_v28 = vadd.f32 %v2866_v26, %v1443_v44  ;;  %v1439_v37 = vmul.f32 %v1372_v49, %v2243_v42 }
 0x438   :  { %v1435_v31 = vmul.f32 %v2846_v10, %v2274_v22  ;;  %v3098_v10 = vld [vmem:[#allocation8_spill] sm:$0xff] }
 0x439   :  { %v1480_v2 = vadd.f32 %v2866_v26, %v1445_v53  ;;  %v1477_v21 = vadd.f32 %v2866_v26, %v1442_v18  ;;  %v1510_v56 = vmax.f32 %v1478_v28, 0.0  ;;  %v1474_v42 = vadd.f32 %v2866_v26, %v1439_v37 }
 0x43a   :  { %v1470_v22 = vadd.f32 %v2866_v26, %v1435_v31  ;;  %v1432_v16 = vmul.f32 %v2837_v33, %v3098_v10 }
 0x43b   :  { %v1512_v6 = vmax.f32 %v1480_v2, 0.0  ;;  %v1506_v61 = vmax.f32 %v1474_v42, 0.0  ;;  %v1504_v2 = vmax.f32 %v1472_v55, 0.0 }
 0x43c   :  { %v1388_v63 = vpop.f32.mrf.mxu3 }
 0x43d   :  { %v1389_v17 = vadd.f32 %v1388_v63, %v1299_v4  ;;  %v1441_v4 = vmul.f32 %v1377_v3, %v2235_v36  ;;  %v1438_v36 = vmul.f32 %v1369_v7, %v2260_v60  ;;  %v1507_v60 = vmax.f32 %v1475_v54, 0.0 }
 0x43f   :  { %v1446_v13 = vmul.f32 %v1389_v17, %v2217_v23  ;;  %v1309_v23 = vpop.f32.mrf.mxu0  ;;  %v1476_v34 = vadd.f32 %v2866_v26, %v1441_v4  ;;  %v1436_v17 = vmul.f32 %v2849_v8, %v2272_v51  ;;  %v1473_v7 = vadd.f32 %v2866_v26, %v1438_v36  ;;  %v3097_v51 = vld [vmem:[#allocation5_spill] sm:$0xff] }
 0x440   :  { %v1433_v8 = vmul.f32 %v2840_v9, %v3097_v51  ;;  %v1502_v4 = vmax.f32 %v1470_v22, 0.0 }
 0x441   :  { %v1481_v58 = vadd.f32 %v2866_v26, %v1446_v13  ;;  %v1508_v53 = vmax.f32 %v1476_v34, 0.0  ;;  %v1505_v13 = vmax.f32 %v1473_v7, 0.0  ;;  %v1471_v3 = vadd.f32 %v2866_v26, %v1436_v17 }
 0x442   :  { %v1468_v9 = vadd.f32 %v2866_v26, %v1433_v8 }
 0x443   :  { %v1513_v0 = vmax.f32 %v1481_v58, 0.0  ;;  %v1503_v18 = vmax.f32 %v1471_v3, 0.0 }
 0x444   :  { %v1391_v5 = vpop.f32.mrf.mxu3  ;;  %v1500_v33 = vmax.f32 %v1468_v9, 0.0 }
 0x445   :  { %v2874_v12 = vadd.f32 %v1391_v5, %v1302_v39  ;;  %1540 = vmatpush.msra.mxu1 %v1513_v0  ;;  %v1509_v39 = vmax.f32 %v1477_v21, 0.0  ;;  %v1431_v5 = vmul.f32 %v2834_v27, %v3099_v30 }
 0x447   :  { %1541 = vmatpush.msra.mxu1 %v1512_v6  ;;  %v1312_v49 = vpop.f32.mrf.mxu0  ;;  %v1467_v6 = vadd.f32 %v2866_v26, %v1432_v16 }
 0x449   :  { %1542 = vmatpush.msra.mxu1 %v1511_v43  ;;  %v1466_v43 = vadd.f32 %v2866_v26, %v1431_v5  ;;  %v1499_v21 = vmax.f32 %v1467_v6, 0.0 }
 0x44b   :  { %1543 = vmatpush.msra.mxu1 %v1510_v56  ;;  %v1498_v37 = vmax.f32 %v1466_v43, 0.0 }
 0x44c   :  { %v1393_v63 = vpop.f32.mrf.mxu3 }
 0x44d   :  { %v2885_v11 = vadd.f32 %v1393_v63, %v1304_v52  ;;  %1544 = vmatpush.msra.mxu1 %v1509_v39  ;;  %v1434_v52 = vmul.f32 %v2843_v57, %v3096_v38 }
 0x44f   :  { %1545 = vmatpush.msra.mxu1 %v1508_v53  ;;  %v1469_v57 = vadd.f32 %v2866_v26, %v1434_v52  ;;  %v1314_v0 = vpop.f32.mrf.mxu0 }
 0x451   :  { %1546 = vmatpush.msra.mxu1 %v1507_v60 }
 0x453   :  { %1547 = vmatpush.msra.mxu1 %v1506_v61 }
 0x454   :  { %v1396_v44 = vpop.f32.mrf.mxu3 }
 0x455   :  { %v2899_v58 = vadd.f32 %v1396_v44, %v1307_v48  ;;  %1548 = vmatpush.msra.mxu1 %v1505_v13  ;;  %v1501_v48 = vmax.f32 %v1469_v57, 0.0 }
 0x457   :  { %1549 = vmatpush.msra.mxu1 %v1504_v2  ;;  %v1317_v27 = vpop.f32.mrf.mxu0 }
 0x459   :  { %1550 = vmatpush.msra.mxu1 %v1503_v18 }
 0x45b   :  { %1551 = vmatpush.msra.mxu1 %v1502_v4 }
 0x45c   :  { %v1398_v28 = vpop.f32.mrf.mxu3 }
 0x45d   :  { %v2909_v29 = vadd.f32 %v1398_v28, %v1309_v23  ;;  %1552 = vmatpush.msra.mxu1 %v1501_v48 }
 0x45f   :  { %1553 = vmatpush.msra.mxu1 %v1500_v33  ;;  %v1319_v39 = vpop.f32.mrf.mxu0  ;;  %v1530_v33 = vlaneseq }
 0x461   :  { %1554 = vmatpush.msra.mxu1 %v1499_v21 }
 0x463   :  { %1555 = vmatpush.msra.mxu1 %v1498_v37 }
 0x464   :  { %v1401_v56 = vpop.f32.mrf.mxu3 }
 0x465   :  { %v2912_v34 = vadd.f32 %v1401_v56, %v1312_v49 }
 0x467   :  { %v1322_v45 = vpop.f32.mrf.mxu0 }
 0x46c   :  { %v1403_v36 = vpop.f32.mrf.mxu3 }
 0x46d   :  { %v2914_v54 = vadd.f32 %v1403_v36, %v1314_v0 }
 0x46f   :  { %v1324_v17 = vpop.f32.mrf.mxu0 }
 0x474   :  { %v1406_v63 = vpop.f32.mrf.mxu3 }
 0x475   :  { %v2916_v23 = vadd.f32 %v1406_v63, %v1317_v27  ;;  %v1583_v27 = vld [vmem:[%s2995_s8 + $0x18] sm:$0xff] }
 0x476   :  { %1603 = vmatpush.msrb.mxu1 %v1583_v27 }
 0x477   :  { %v1327_v31 = vpop.f32.mrf.mxu0 }
 0x47c   :  { %v1408_v53 = vpop.f32.mrf.mxu3 }
 0x47d   :  { %v1409_v42 = vadd.f32 %v1408_v53, %v1319_v39  ;;  %v1582_v39 = vld [vmem:[%s2995_s8 + $0x10] sm:$0xff] }
 0x47e   :  { %1604 = vmatpush.msrb.mxu1 %v1582_v39 }
 0x47f   :  { %v1329_v38 = vpop.f32.mrf.mxu0 }
 0x484   :  { %v1411_v60 = vpop.f32.mrf.mxu3 }
 0x485   :  { %v1412_v7 = vadd.f32 %v1411_v60, %v1322_v45 }
 0x487   :  { %v1332_v49 = vpop.f32.mrf.mxu0  ;;  %v1455_v60 = vmul.f32 %v1412_v7, %v2231_v32  ;;  %v1452_v32 = vmul.f32 %v2914_v54, %v2249_v47  ;;  %v1449_v47 = vmul.f32 %v2899_v58, %v2258_v59 }
 0x48c   :  { %v1413_v61 = vpop.f32.mrf.mxu3 }
 0x48d   :  { %v1414_v43 = vadd.f32 %v1413_v61, %v1324_v17  ;;  %v1899_v17 = vmov 1.0  }
 0x48f   :  { %v1334_v3 = vpop.f32.mrf.mxu0  ;;  %v1456_v63 = vmul.f32 %v1414_v43, %v2233_v35  ;;  %v1454_v35 = vmul.f32 %v1409_v42, %v2241_v41  ;;  %v1451_v41 = vmul.f32 %v2912_v34, %v2247_v46  ;;  %v1448_v46 = vmul.f32 %v2885_v11, %v2293_v1 }
 0x491   :  { %v1483_v58 = vadd.f32 %v2866_v26, %v1448_v46 }
 0x493   :  { %v1515_v11 = vmax.f32 %v1483_v58, 0.0 }
 0x494   :  { %v1416_v55 = vpop.f32.mrf.mxu3 }
 0x495   :  { %v1417_v9 = vadd.f32 %v1416_v55, %v1327_v31 }
 0x497   :  { %v1337_v51 = vpop.f32.mrf.mxu0  ;;  %v1457_v56 = vmul.f32 %v1417_v9, %v2219_v24  ;;  %v1581_v24 = vld [vmem:[%s2995_s8 + $0x8] sm:$0xff] }
 0x498   :  { %1605 = vmatpush.msrb.mxu1 %v1581_v24 }
 0x499   :  { %v1492_v61 = vadd.f32 %v2866_v26, %v1457_v56 }
 0x49c   :  { %v1418_v52 = vpop.f32.mrf.mxu3 }
 0x49d   :  { %v1419_v30 = vadd.f32 %v1418_v52, %v1329_v38  ;;  %v1491_v38 = vadd.f32 %v2866_v26, %v1456_v63  ;;  %v1453_v52 = vmul.f32 %v2916_v23, %v2239_v40  ;;  %v1450_v40 = vmul.f32 %v2909_v29, %v2269_v50 }
 0x49e   :  { %v1447_v50 = vmul.f32 %v2874_v12, %v2289_v62  ;;  %v1580_v62 = vld [vmem:[%s2995_s8] sm:$0xff] }
 0x49f   :  { %v1339_v10 = vpop.f32.mrf.mxu0  ;;  %v1458_v21 = vmul.f32 %v1419_v30, %v2221_v25  ;;  %v1523_v7 = vmax.f32 %v1491_v38, 0.0  ;;  %1606 = vmatpush.msrb.mxu1 %v1580_v62 }
 0x4a1   :  { %v1493_v53 = vadd.f32 %v2866_v26, %v1458_v21 }
 0x4a3   :  { %v1525_v55 = vmax.f32 %v1493_v53, 0.0 }
 0x4a4   :  { %v1421_v13 = vpop.f32.mrf.mxu3 }
 0x4a5   :  { %v1422_v18 = vadd.f32 %v1421_v13, %v1332_v49  ;;  %v1524_v49 = vmax.f32 %v1492_v61, 0.0  ;;  %v1490_v13 = vadd.f32 %v2866_v26, %v1455_v60 }
 0x4a7   :  { %v1459_v48 = vmul.f32 %v1422_v18, %v2205_v15  ;;  %v1522_v42 = vmax.f32 %v1490_v13, 0.0 }
 0x4a9   :  { %v1494_v36 = vadd.f32 %v2866_v26, %v1459_v48 }
 0x4ab   :  { %v1526_v31 = vmax.f32 %v1494_v36, 0.0 }
 0x4ac   :  { %v1423_v44 = vpop.f32.mrf.mxu3 }
 0x4ad   :  { %v1424_v22 = vadd.f32 %v1423_v44, %v1334_v3  ;;  %v1489_v3 = vadd.f32 %v2866_v26, %v1454_v35  ;;  %v1488_v44 = vadd.f32 %v2866_v26, %v1453_v52 }
 0x4af   :  { %v1460_v5 = vmul.f32 %v1424_v22, %v2213_v20  ;;  %v2929_v20 = vld [vmem:[%s2989_s2] sm:$0x3]  ;;  %v1521_v23 = vmax.f32 %v1489_v3, 0.0  ;;  %v1520_v54 = vmax.f32 %v1488_v44, 0.0  ;;  %v1484_v22 = vadd.f32 %v2866_v26, %v1449_v47 }
 0x4b0   :  { %v1532_v15 = vperm.slane %v2929_v20, 0  ;;  %v1533_v1 = vperm.slane %v2929_v20, 1 }
 0x4b4   :  { %v1426_v8 = vpop.f32.mrf.mxu3 }
 0x4b5   :  { %v1427_v2 = vadd.f32 %v1426_v8, %v1337_v51  ;;  %v1487_v51 = vadd.f32 %v2866_v26, %v1452_v32  ;;  %v1486_v8 = vadd.f32 %v2866_v26, %v1451_v41 }
 0x4b7   :  { %v1461_v57 = vmul.f32 %v1427_v2, %v2203_v14  ;;  %v1495_v14 = vadd.f32 %v2866_v26, %v1460_v5  ;;  %v1519_v34 = vmax.f32 %v1487_v51, 0.0  ;;  %v1485_v2 = vadd.f32 %v2866_v26, %v1450_v40 }
 0x4b8   :  { %v1518_v29 = vmax.f32 %v1486_v8, 0.0 }
 0x4b9   :  { %v1496_v28 = vadd.f32 %v2866_v26, %v1461_v57  ;;  %v1527_v45 = vmax.f32 %v1495_v14, 0.0  ;;  %v1517_v59 = vmax.f32 %v1485_v2, 0.0 }
 0x4bb   :  { %v1528_v25 = vmax.f32 %v1496_v28, 0.0 }
 0x4bc   :  { %v1428_v16 = vpop.f32.mrf.mxu3 }
 0x4bd   :  { %v1429_v0 = vadd.f32 %v1428_v16, %v1339_v10  ;;  %v1516_v10 = vmax.f32 %v1484_v22, 0.0  ;;  %v1482_v16 = vadd.f32 %v2866_v26, %v1447_v50 }
 0x4bf   :  { %v1462_v4 = vmul.f32 %v1429_v0, %v2211_v19  ;;  %v2931_v19 = vshrl.u32 %v1530_v33, 7  ;;  %v1514_v18 = vmax.f32 %v1482_v16, 0.0 }
 0x4c1   :  { %v1497_v6 = vadd.f32 %v2866_v26, %v1462_v4  ;;  %vm1534_vm2 = vcmp.eq.s32.totalorder %v1532_v15, %v2931_v19  ;;  %vm1535_vm3 = vcmp.eq.s32.totalorder %v1533_v1, %v2931_v19  ;;  %v1871_v26 = vld [vmem:[%s2996_s9] ss:$0 sm:$0xff] }
 0x4c2   :  { %1823 = vmatmul.msk.f32.vlgmr.msra.gmra.mxu1 %vm1534_vm2, %v1899_v17 }
 0x4c3   :  { %v1529_v37 = vmax.f32 %v1497_v6, 0.0 }
 0x4c5   :  { %1560 = vmatpush.msra.mxu2 %v1529_v37 }
 0x4c7   :  { %1561 = vmatpush.msra.mxu2 %v1528_v25 }
 0x4c9   :  { %1562 = vmatpush.msra.mxu2 %v1527_v45 }
 0x4cb   :  { %1563 = vmatpush.msra.mxu2 %v1526_v31 }
 0x4cd   :  { %1564 = vmatpush.msra.mxu2 %v1525_v55 }
 0x4cf   :  { %1565 = vmatpush.msra.mxu2 %v1524_v49 }
 0x4d1   :  { %1566 = vmatpush.msra.mxu2 %v1523_v7 }
 0x4d3   :  { %1567 = vmatpush.msra.mxu2 %v1522_v42 }
 0x4d5   :  { %1568 = vmatpush.msra.mxu2 %v1521_v23 }
 0x4d7   :  { %1569 = vmatpush.msra.mxu2 %v1520_v54 }
 0x4d9   :  { %1570 = vmatpush.msra.mxu2 %v1519_v34 }
 0x4db   :  { %1571 = vmatpush.msra.mxu2 %v1518_v29 }
 0x4dd   :  { %1572 = vmatpush.msra.mxu2 %v1517_v59 }
 0x4df   :  { %1573 = vmatpush.msra.mxu2 %v1516_v10 }
 0x4e1   :  { %1574 = vmatpush.msra.mxu2 %v1515_v11 }
 0x4e3   :  { %1575 = vmatpush.msra.mxu2 %v1514_v18 }
 0x4e4   :  { %1824 = vmatmul.msk.f32.vlgmr.msra.gmra.mxu2 %vm1535_vm3, %v1899_v17 }
 0x53f   :  { %v1557_v12 = vpop.f32.mrf.mxu1 }
 0x567   :  { %v1577_v57 = vpop.f32.mrf.mxu2 }
 0x568   :  { %v1578_v0 = vadd.f32 %v1577_v57, %v1557_v12 }
 0x56a   :  { %1825 = vmatmul.msk.f32.vlgmr.msrb.gmra.mxu1 %vm995_vm1, %v1578_v0 }
 0x5e7   :  { %v1608_v30 = vpop.f32.mrf.mxu1 }
 0x5e8   :  { %v1609_v5 = vadd.f32 %v1871_v26, %v1608_v30 }
 0x5ea   :  { %1612 = vst.msk [vmem:[#allocation2] sm:$0x3] %vm1611_vm4, %v1609_v5 }
 0x5eb   :  { %1623 = dma.vmem_to_hbm [thread:$0]  %s1619_s23, 32, %s1621_s6, [#allocation3]  }
 0x5ec   :  { %1896 = dma.done.wait [#allocation3], 32  }
 0x5ed   :  { %1897 = vsyncadd [#allocation3], 4294967264 }
 0x5ee   :  { %1628 = vsyncpa [#allocation3], 1 }

</bundles_post_ra>
